<compile_context>
chip_gen: v7x
topology: tpu7x:2x2x1
jax: 0.10.0
libtpu: 0.0.40
codegen_flags: <defaults>
</compile_context>

<pallas_src>
import functools

import jax
import jax.numpy as jnp
from jax.experimental import pallas as pl
from jax.experimental.pallas import tpu as pltpu


LANE = 128           # TPU lane width
VMEM_LIMIT = 64 << 20  # give the pipeliner headroom beyond the scoped default


# ----------------------------- small helpers -----------------------------

def _round_up(n, m):
    return ((n + m - 1) // m) * m


def _seq_tile(b, t, row_cap=512):
    """Largest divisor of b such that tile*t <= row_cap (>=1)."""
    cap = max(1, row_cap // max(t, 1))
    best = 1
    for d in range(1, b + 1):
        if b % d == 0 and d <= cap:
            best = d
    return best


def _row_tile(m, cap=512):
    """Row tile for (B*T)-row matmuls: full if small, else a multiple-of-8 divisor <= cap."""
    if m <= cap:
        return m
    for d in range(cap, 0, -1):
        if m % d == 0 and d % 8 == 0:
            return d
    return m


def _vocab_tile(vp, cap=1024):
    """Vocab tile: multiple of 128 dividing vp, <= cap."""
    best = min(vp, LANE)
    for d in range(LANE, min(vp, cap) + 1, LANE):
        if vp % d == 0:
            best = d
    return best


# ----------------------------- in-kernel helpers -----------------------------

def _layernorm_padded(x, gamma, beta, c_real, eps=1e-5):
    """LayerNorm over the first c_real lanes of a lane-padded (M, C_pad) activation.

    Invariant: lanes >= c_real are exactly zero, so full-width (lane-dense) reductions give
    the true moments:  mean = sum(x)/c_real,  var = sum(x^2)/c_real - mean^2 (biased, as torch).
    gamma/beta are zero in the padded lanes so the output keeps the zero-padding invariant.
    """
    s1 = jnp.sum(x, axis=-1, keepdims=True)
    s2 = jnp.sum(x * x, axis=-1, keepdims=True)
    inv_c = 1.0 / c_real
    mean = s1 * inv_c
    var = s2 * inv_c - mean * mean
    inv = jax.lax.rsqrt(var + eps)
    return (x - mean) * inv * gamma + beta


# ----------------------------- transformer block kernel -----------------------------

def transformer_block_kernel(n_head, c_real,
                             x_ref,
                             ln1_g_ref, ln1_b_ref,
                             wqkv_ref, wo_ref, bo_ref,
                             ln2_g_ref, ln2_b_ref,
                             w1_ref, b1_ref, w2_ref, b2_ref,
                             out_ref):
    x = x_ref[...]                                   # (S, T, Cp) float32, one tile of sequences
    S, T, Cp = x.shape
    H = n_head
    hs = c_real // H
    xf = x.reshape(S * T, Cp)                        # lane-dense row block for the matmuls

    # ---------------- self-attention branch ----------------
    xn = _layernorm_padded(xf, ln1_g_ref[...], ln1_b_ref[...], c_real)
    qkv = jnp.dot(xn.astype(jnp.bfloat16), wqkv_ref[...],
                  preferred_element_type=jnp.float32)            # (S*T, 3*Cp), f32 accum
    q = qkv[:, 0 * Cp:0 * Cp + c_real]
    k = qkv[:, 1 * Cp:1 * Cp + c_real]
    v = qkv[:, 2 * Cp:2 * Cp + c_real]

    # Heads become a leading batch axis; attention is two batched contractions
    # (no per-head matmuls).  Batch index = h * S + s.
    def split_heads(t):                              # (S*T, C) -> (H*S, T, hs)
        parts = [t[:, h * hs:(h + 1) * hs].reshape(S, T, hs) for h in range(H)]
        return jnp.concatenate(parts, axis=0).astype(jnp.bfloat16)

    qb = split_heads(q)                              # 1/sqrt(hs) already folded into Wq
    kb = split_heads(k)
    vb = split_heads(v)

    scores = jnp.einsum('bqd,bkd->bqk', qb, kb,
                        preferred_element_type=jnp.float32)      # (H*S, T, T) f32
    row = jax.lax.broadcasted_iota(jnp.int32, (T, T), 0)
    col = jax.lax.broadcasted_iota(jnp.int32, (T, T), 1)
    scores = jnp.where((row >= col)[None, :, :], scores, -1e30)  # finite mask constant
    scores = scores - jnp.max(scores, axis=-1, keepdims=True)
    p = jnp.exp(scores)
    denom = jnp.sum(p, axis=-1, keepdims=True)
    p = p * pl.reciprocal(denom, approx=True)                    # EUP, not a VALU divide

    ctx = jnp.einsum('bqk,bkd->bqd', p.astype(jnp.bfloat16), vb,
                     preferred_element_type=jnp.float32)         # (H*S, T, hs)
    ctx = jnp.concatenate(
        [ctx[h * S:(h + 1) * S].reshape(S * T, hs) for h in range(H)], axis=-1)  # (S*T, C)

    attn = jnp.dot(ctx.astype(jnp.bfloat16), wo_ref[...],
                   preferred_element_type=jnp.float32) + bo_ref[...]
    y = xf + attn                                    # dropout == identity (eval)

    # ---------------- feed-forward branch ----------------
    xn2 = _layernorm_padded(y, ln2_g_ref[...], ln2_b_ref[...], c_real)
    hid = jnp.dot(xn2.astype(jnp.bfloat16), w1_ref[...],
                  preferred_element_type=jnp.float32) + b1_ref[...]
    hid = jnp.maximum(hid, 0.0)
    ff = jnp.dot(hid.astype(jnp.bfloat16), w2_ref[...],
                 preferred_element_type=jnp.float32) + b2_ref[...]
    out_ref[...] = (y + ff).reshape(S, T, Cp)


# ----------------------------- final LN + lm_head kernel -----------------------------

def lm_head_kernel(c_real, x_ref, g_ref, b_ref, w_ref, bias_ref, out_ref):
    xn = _layernorm_padded(x_ref[...], g_ref[...], b_ref[...], c_real)
    out_ref[...] = jnp.dot(xn.astype(jnp.bfloat16), w_ref[...],
                           preferred_element_type=jnp.float32) + bias_ref[...]


# ----------------------------- wrappers -----------------------------

def _const_spec(arr):
    # whole-array BlockSpec for weights (index map is constant across the grid)
    n = arr.ndim
    return pl.BlockSpec(arr.shape, lambda *args: (0,) * n)
    # TODO(synk): on v7x with large C, use pipeline_mode=pl.Buffered(1) here (constant index
    # needs no double buffer).


def run_transformer_block(x, bp, n_head, c_real, tile_seq):
    B, T, Cp = x.shape
    weights = [bp["ln1_g"], bp["ln1_b"],
               bp["wqkv"], bp["wo"], bp["bo"],
               bp["ln2_g"], bp["ln2_b"],
               bp["w1"], bp["b1"], bp["w2"], bp["b2"]]
    in_specs = ([pl.BlockSpec((tile_seq, T, Cp), lambda s: (s, 0, 0))]
                + [_const_spec(w) for w in weights])
    return pl.pallas_call(
        functools.partial(transformer_block_kernel, n_head, c_real),
        out_shape=jax.ShapeDtypeStruct((B, T, Cp), x.dtype),
        grid=(B // tile_seq,),
        in_specs=in_specs,
        out_specs=pl.BlockSpec((tile_seq, T, Cp), lambda s: (s, 0, 0)),
        compiler_params=pltpu.CompilerParams(
            dimension_semantics=("parallel",),
            vmem_limit_bytes=VMEM_LIMIT),
    )(x, *weights)


def run_lm_head(x, lnf_g, lnf_b, lm_w, lm_b, vocab_size, c_real, tile_r, tile_v):
    B, T, Cp = x.shape
    M = B * T
    Vp = lm_w.shape[1]
    x2d = x.reshape(M, Cp)
    logits_pad = pl.pallas_call(
        functools.partial(lm_head_kernel, c_real),
        out_shape=jax.ShapeDtypeStruct((M, Vp), jnp.float32),
        grid=(M // tile_r, Vp // tile_v),
        in_specs=[pl.BlockSpec((tile_r, Cp), lambda r, v: (r, 0)),
                  pl.BlockSpec((1, Cp), lambda r, v: (0, 0)),
                  pl.BlockSpec((1, Cp), lambda r, v: (0, 0)),
                  pl.BlockSpec((Cp, tile_v), lambda r, v: (0, v)),
                  pl.BlockSpec((1, tile_v), lambda r, v: (0, v))],
        out_specs=pl.BlockSpec((tile_r, tile_v), lambda r, v: (r, v)),
        compiler_params=pltpu.CompilerParams(
            dimension_semantics=("parallel", "parallel"),
            vmem_limit_bytes=VMEM_LIMIT),
    )(x2d, lnf_g, lnf_b, lm_w, lm_b)
    return logits_pad.reshape(B, T, Vp)[:, :, :vocab_size]


def gpt_forward(index, params, targets=None):
    B, T = index.shape
    cfg = params["config"]
    C = cfg["n_embd"]
    n_head = cfg["n_head"]
    vocab_size = cfg["vocab_size"]

    tok_emb = params["tok_emb"][index]                 # (B, T, Cp) gather — plain-JAX glue
    pos_emb = params["pos_emb"][:T]                    # (T, Cp)
    x = tok_emb + pos_emb

    tile_seq = _seq_tile(B, T)
    for bp in params["blocks"]:
        x = run_transformer_block(x, bp, n_head, C, tile_seq)

    tile_r = _row_tile(B * T)
    tile_v = _vocab_tile(params["lm_w"].shape[1])
    logits = run_lm_head(x, params["lnf_g"], params["lnf_b"],
                         params["lm_w"], params["lm_b"],
                         vocab_size, C, tile_r, tile_v)

    if targets is None:
        return logits, None
    V = logits.shape[-1]
    logits2d = logits.reshape(B * T, V)
    t = targets.reshape(B * T)
    logp = jax.nn.log_softmax(logits2d, axis=-1)
    nll = -jnp.take_along_axis(logp, t[:, None], axis=-1)[:, 0]
    return logits, jnp.mean(nll)


# ----------------------------- deterministic parameter init -----------------------------

def init_params(key, vocab_size, n_embd, n_head, n_layer, block_size):
    C = n_embd
    Cp = _round_up(C, LANE)                 # lane-padded embedding width
    Hf = 4 * C                              # FFN hidden (torch: 4 * n_embd)
    Hp = _round_up(Hf, LANE)
    Vp = _round_up(vocab_size, LANE)
    hs = C // n_head

    keys = iter(jax.random.split(key, 16 + 8 * n_layer))

    def normal(shape):
        return (0.02 * jax.random.normal(next(keys), shape)).astype(jnp.float32)

    def pad2(a, shape, dtype=jnp.float32):
        out = jnp.zeros(shape, jnp.float32)
        out = out.at[:a.shape[0], :a.shape[1]].set(a)
        return out.astype(dtype)

    def ln_pair():
        g = jnp.zeros((1, Cp), jnp.float32).at[:, :C].set(1.0)   # zero in padded lanes
        b = jnp.zeros((1, Cp), jnp.float32)
        return g, b

    params = {
        "config": {"n_embd": C, "n_embd_pad": Cp, "n_head": n_head,
                   "vocab_size": vocab_size, "vocab_pad": Vp},
        "tok_emb": pad2(normal((vocab_size, C)), (vocab_size, Cp)),
        "pos_emb": pad2(normal((block_size, C)), (block_size, Cp)),
        "blocks": [],
    }
    params["lnf_g"], params["lnf_b"] = ln_pair()
    params["lm_w"] = pad2(normal((C, vocab_size)), (Cp, Vp), jnp.bfloat16)
    params["lm_b"] = jnp.zeros((1, Vp), jnp.float32)

    for _ in range(n_layer):
        wq = normal((C, C)) * (hs ** -0.5)          # fold 1/sqrt(head_size) into Wq
        wk = normal((C, C))
        wv = normal((C, C))
        wqkv = jnp.zeros((Cp, 3 * Cp), jnp.float32)
        wqkv = wqkv.at[:C, 0 * Cp:0 * Cp + C].set(wq)
        wqkv = wqkv.at[:C, 1 * Cp:1 * Cp + C].set(wk)
        wqkv = wqkv.at[:C, 2 * Cp:2 * Cp + C].set(wv)
        g1, b1 = ln_pair()
        g2, b2 = ln_pair()
        bp = {
            "ln1_g": g1, "ln1_b": b1,
            "wqkv": wqkv.astype(jnp.bfloat16),
            "wo": pad2(normal((C, C)), (C, Cp), jnp.bfloat16),
            "bo": jnp.zeros((1, Cp), jnp.float32),
            "ln2_g": g2, "ln2_b": b2,
            "w1": pad2(normal((C, Hf)), (Cp, Hp), jnp.bfloat16),
            "b1": jnp.zeros((1, Hp), jnp.float32),
            "w2": pad2(normal((Hf, C)), (Hp, Cp), jnp.bfloat16),
            "b2": jnp.zeros((1, Cp), jnp.float32),
        }
        params["blocks"].append(bp)
    return params


# ----------------------------- main -----------------------------

if __name__ == "__main__":
    vocab_size, n_embd, n_head, n_layer, block_size = 65, 32, 4, 2, 8
    B, T = 2, 8

    root = jax.random.PRNGKey(0)
    k_params, k_idx, k_tgt = jax.random.split(root, 3)
    params = init_params(k_params, vocab_size, n_embd, n_head, n_layer, block_size)
    index = jax.random.randint(k_idx, (B, T), 0, vocab_size, dtype=jnp.int32)
    targets = jax.random.randint(k_tgt, (B, T), 0, vocab_size, dtype=jnp.int32)

    logits, loss = gpt_forward(index, params, targets=None)
    jax.block_until_ready(logits)
    assert logits.shape == (B, T, vocab_size)
    assert loss is None

    logits2, loss2 = gpt_forward(index, params, targets=targets)
    jax.block_until_ready(loss2)
    assert loss2.shape == ()
    assert bool(jnp.isfinite(loss2))
    # TODO(synk): dropout is a no-op here (eval semantics); training-mode dropout and the
    # autoregressive generate() multinomial sampling loop are not implemented.
    print("KERNEL_OK")
</pallas_src>

<mosaic_0001>
module attributes {stable_mosaic.version = 11 : i64} {
  func.func @transformer_block_kernel(%arg0: i32, %arg1: memref<2x8x128xf32, #tpu.memory_space<vmem>>, %arg2: memref<1x128xf32, #tpu.memory_space<vmem>>, %arg3: memref<1x128xf32, #tpu.memory_space<vmem>>, %arg4: memref<128x384xbf16, #tpu.memory_space<vmem>>, %arg5: memref<32x128xbf16, #tpu.memory_space<vmem>>, %arg6: memref<1x128xf32, #tpu.memory_space<vmem>>, %arg7: memref<1x128xf32, #tpu.memory_space<vmem>>, %arg8: memref<1x128xf32, #tpu.memory_space<vmem>>, %arg9: memref<128x128xbf16, #tpu.memory_space<vmem>>, %arg10: memref<1x128xf32, #tpu.memory_space<vmem>>, %arg11: memref<128x128xbf16, #tpu.memory_space<vmem>>, %arg12: memref<1x128xf32, #tpu.memory_space<vmem>>, %arg13: memref<2x8x128xf32, #tpu.memory_space<vmem>>) attributes {dimension_semantics = [#tpu.dimension_semantics<parallel>], iteration_bounds = array<i64: 1>, scalar_prefetch = 0 : i64, scratch_operands = 0 : i64, tpu.core_type = #tpu.core_type<tc>, window_params = [{transform_indices = @transform_0, window_bounds = array<i64: 2, 8, 128>}, {pipeline_mode = #tpu.pipeline_mode<synchronous>, transform_indices = @transform_1, window_bounds = array<i64: 1, 128>}, {pipeline_mode = #tpu.pipeline_mode<synchronous>, transform_indices = @transform_2, window_bounds = array<i64: 1, 128>}, {pipeline_mode = #tpu.pipeline_mode<synchronous>, transform_indices = @transform_3, window_bounds = array<i64: 128, 384>}, {pipeline_mode = #tpu.pipeline_mode<synchronous>, transform_indices = @transform_4, window_bounds = array<i64: 32, 128>}, {pipeline_mode = #tpu.pipeline_mode<synchronous>, transform_indices = @transform_5, window_bounds = array<i64: 1, 128>}, {pipeline_mode = #tpu.pipeline_mode<synchronous>, transform_indices = @transform_6, window_bounds = array<i64: 1, 128>}, {pipeline_mode = #tpu.pipeline_mode<synchronous>, transform_indices = @transform_7, window_bounds = array<i64: 1, 128>}, {pipeline_mode = #tpu.pipeline_mode<synchronous>, transform_indices = @transform_8, window_bounds = array<i64: 128, 128>}, {pipeline_mode = #tpu.pipeline_mode<synchronous>, transform_indices = @transform_9, window_bounds = array<i64: 1, 128>}, {pipeline_mode = #tpu.pipeline_mode<synchronous>, transform_indices = @transform_10, window_bounds = array<i64: 128, 128>}, {pipeline_mode = #tpu.pipeline_mode<synchronous>, transform_indices = @transform_11, window_bounds = array<i64: 1, 128>}, {transform_indices = @transform_12, window_bounds = array<i64: 2, 8, 128>}]} {
    %c0 = arith.constant 0 : index
    %c0_0 = arith.constant 0 : index
    %c0_1 = arith.constant 0 : index
    %0 = vector.load %arg1[%c0, %c0_0, %c0_1] : memref<2x8x128xf32, #tpu.memory_space<vmem>>, vector<2x8x128xf32>
    %1 = vector.shape_cast %0 : vector<2x8x128xf32> to vector<16x128xf32>
    %c0_2 = arith.constant 0 : index
    %c0_3 = arith.constant 0 : index
    %2 = vector.load %arg2[%c0_2, %c0_3] : memref<1x128xf32, #tpu.memory_space<vmem>>, vector<1x128xf32>
    %c0_4 = arith.constant 0 : index
    %c0_5 = arith.constant 0 : index
    %3 = vector.load %arg3[%c0_4, %c0_5] : memref<1x128xf32, #tpu.memory_space<vmem>>, vector<1x128xf32>
    %cst = arith.constant dense<0.000000e+00> : vector<16xf32>
    %4 = vector.multi_reduction <add>, %1, %cst [1] : vector<16x128xf32> to vector<16xf32>
    %5 = vector.shape_cast %4 : vector<16xf32> to vector<16x1xf32>
    %6 = arith.mulf %1, %1 : vector<16x128xf32>
    %cst_6 = arith.constant dense<0.000000e+00> : vector<16xf32>
    %7 = vector.multi_reduction <add>, %6, %cst_6 [1] : vector<16x128xf32> to vector<16xf32>
    %8 = vector.shape_cast %7 : vector<16xf32> to vector<16x1xf32>
    %cst_7 = arith.constant 3.125000e-02 : f32
    %9 = vector.broadcast %cst_7 : f32 to vector<16x1xf32>
    %10 = arith.mulf %5, %9 : vector<16x1xf32>
    %cst_8 = arith.constant 3.125000e-02 : f32
    %11 = vector.broadcast %cst_8 : f32 to vector<16x1xf32>
    %12 = arith.mulf %8, %11 : vector<16x1xf32>
    %13 = arith.mulf %10, %10 : vector<16x1xf32>
    %14 = arith.subf %12, %13 : vector<16x1xf32>
    %cst_9 = arith.constant 9.99999974E-6 : f32
    %15 = vector.broadcast %cst_9 : f32 to vector<16x1xf32>
    %16 = arith.addf %14, %15 : vector<16x1xf32>
    %17 = math.rsqrt %16 : vector<16x1xf32>
    %18 = vector.broadcast %10 : vector<16x1xf32> to vector<16x128xf32>
    %19 = arith.subf %1, %18 : vector<16x128xf32>
    %20 = vector.broadcast %17 : vector<16x1xf32> to vector<16x128xf32>
    %21 = arith.mulf %19, %20 : vector<16x128xf32>
    %22 = vector.broadcast %2 : vector<1x128xf32> to vector<16x128xf32>
    %23 = arith.mulf %21, %22 : vector<16x128xf32>
    %24 = vector.broadcast %3 : vector<1x128xf32> to vector<16x128xf32>
    %25 = arith.addf %23, %24 : vector<16x128xf32>
    %26 = arith.truncf %25 : vector<16x128xf32> to vector<16x128xbf16>
    %c0_10 = arith.constant 0 : index
    %c0_11 = arith.constant 0 : index
    %27 = vector.load %arg4[%c0_10, %c0_11] : memref<128x384xbf16, #tpu.memory_space<vmem>>, vector<128x384xbf16>
    %cst_12 = arith.constant dense<0.000000e+00> : vector<16x384xf32>
    %28 = tpu.matmul %26, %27, %cst_12 {dimension_numbers = #tpu.dot_dimension_numbers<[1], [0], [0], [1], [0, 0, 1, 1], [], []>} : vector<16x128xbf16>, vector<128x384xbf16>, vector<16x384xf32> -> vector<16x384xf32>
    %29 = vector.extract_strided_slice %28 {offsets = [0, 0], sizes = [16, 32], strides = [1, 1]} : vector<16x384xf32> to vector<16x32xf32>
    %30 = vector.extract_strided_slice %28 {offsets = [0, 128], sizes = [16, 32], strides = [1, 1]} : vector<16x384xf32> to vector<16x32xf32>
    %31 = vector.extract_strided_slice %28 {offsets = [0, 256], sizes = [16, 32], strides = [1, 1]} : vector<16x384xf32> to vector<16x32xf32>
    %32 = vector.extract_strided_slice %29 {offsets = [0, 0], sizes = [16, 8], strides = [1, 1]} : vector<16x32xf32> to vector<16x8xf32>
    %33 = vector.shape_cast %32 : vector<16x8xf32> to vector<2x8x8xf32>
    %34 = vector.extract_strided_slice %29 {offsets = [0, 8], sizes = [16, 8], strides = [1, 1]} : vector<16x32xf32> to vector<16x8xf32>
    %35 = vector.shape_cast %34 : vector<16x8xf32> to vector<2x8x8xf32>
    %36 = vector.extract_strided_slice %29 {offsets = [0, 16], sizes = [16, 8], strides = [1, 1]} : vector<16x32xf32> to vector<16x8xf32>
    %37 = vector.shape_cast %36 : vector<16x8xf32> to vector<2x8x8xf32>
    %38 = vector.extract_strided_slice %29 {offsets = [0, 24], sizes = [16, 8], strides = [1, 1]} : vector<16x32xf32> to vector<16x8xf32>
    %39 = vector.shape_cast %38 : vector<16x8xf32> to vector<2x8x8xf32>
    %40 = tpu.concatenate %33, %35, %37, %39 in 0 : vector<2x8x8xf32>, vector<2x8x8xf32>, vector<2x8x8xf32>, vector<2x8x8xf32> -> vector<8x8x8xf32>
    %41 = arith.truncf %40 : vector<8x8x8xf32> to vector<8x8x8xbf16>
    %42 = vector.extract_strided_slice %30 {offsets = [0, 0], sizes = [16, 8], strides = [1, 1]} : vector<16x32xf32> to vector<16x8xf32>
    %43 = vector.shape_cast %42 : vector<16x8xf32> to vector<2x8x8xf32>
    %44 = vector.extract_strided_slice %30 {offsets = [0, 8], sizes = [16, 8], strides = [1, 1]} : vector<16x32xf32> to vector<16x8xf32>
    %45 = vector.shape_cast %44 : vector<16x8xf32> to vector<2x8x8xf32>
    %46 = vector.extract_strided_slice %30 {offsets = [0, 16], sizes = [16, 8], strides = [1, 1]} : vector<16x32xf32> to vector<16x8xf32>
    %47 = vector.shape_cast %46 : vector<16x8xf32> to vector<2x8x8xf32>
    %48 = vector.extract_strided_slice %30 {offsets = [0, 24], sizes = [16, 8], strides = [1, 1]} : vector<16x32xf32> to vector<16x8xf32>
    %49 = vector.shape_cast %48 : vector<16x8xf32> to vector<2x8x8xf32>
    %50 = tpu.concatenate %43, %45, %47, %49 in 0 : vector<2x8x8xf32>, vector<2x8x8xf32>, vector<2x8x8xf32>, vector<2x8x8xf32> -> vector<8x8x8xf32>
    %51 = arith.truncf %50 : vector<8x8x8xf32> to vector<8x8x8xbf16>
    %52 = vector.extract_strided_slice %31 {offsets = [0, 0], sizes = [16, 8], strides = [1, 1]} : vector<16x32xf32> to vector<16x8xf32>
    %53 = vector.shape_cast %52 : vector<16x8xf32> to vector<2x8x8xf32>
    %54 = vector.extract_strided_slice %31 {offsets = [0, 8], sizes = [16, 8], strides = [1, 1]} : vector<16x32xf32> to vector<16x8xf32>
    %55 = vector.shape_cast %54 : vector<16x8xf32> to vector<2x8x8xf32>
    %56 = vector.extract_strided_slice %31 {offsets = [0, 16], sizes = [16, 8], strides = [1, 1]} : vector<16x32xf32> to vector<16x8xf32>
    %57 = vector.shape_cast %56 : vector<16x8xf32> to vector<2x8x8xf32>
    %58 = vector.extract_strided_slice %31 {offsets = [0, 24], sizes = [16, 8], strides = [1, 1]} : vector<16x32xf32> to vector<16x8xf32>
    %59 = vector.shape_cast %58 : vector<16x8xf32> to vector<2x8x8xf32>
    %60 = tpu.concatenate %53, %55, %57, %59 in 0 : vector<2x8x8xf32>, vector<2x8x8xf32>, vector<2x8x8xf32>, vector<2x8x8xf32> -> vector<8x8x8xf32>
    %61 = arith.truncf %60 : vector<8x8x8xf32> to vector<8x8x8xbf16>
    "tpu.trace_start"() <{level = 10 : i32, message = "bqd,bkd->bqk"}> : () -> ()
    %cst_13 = arith.constant dense<0.000000e+00> : vector<8x8x8xf32>
    %62 = tpu.matmul %41, %51, %cst_13 {dimension_numbers = #tpu.dot_dimension_numbers<[2], [2], [1], [1], [0, 0, 0, 1, 1, 1], [0], [0]>} : vector<8x8x8xbf16>, vector<8x8x8xbf16>, vector<8x8x8xf32> -> vector<8x8x8xf32>
    "tpu.trace_stop"() : () -> ()
    %63 = tpu.iota {dimensions = array<i32: 0>} : vector<8x8xi32>
    %64 = tpu.iota {dimensions = array<i32: 1>} : vector<8x8xi32>
    %65 = arith.cmpi sge, %63, %64 : vector<8x8xi32>
    %66 = vector.shape_cast %65 : vector<8x8xi1> to vector<1x8x8xi1>
    %cst_14 = arith.constant -1.000000e+30 : f32
    %67 = vector.shape_cast %66 : vector<1x8x8xi1> to vector<1x8x8xi1>
    %68 = vector.broadcast %67 : vector<1x8x8xi1> to vector<8x8x8xi1>
    %69 = vector.broadcast %cst_14 : f32 to vector<8x8x8xf32>
    %70 = arith.select %68, %62, %69 : vector<8x8x8xi1>, vector<8x8x8xf32>
    %cst_15 = arith.constant dense<0xFF800000> : vector<8x8xf32>
    %71 = vector.multi_reduction <maximumf>, %70, %cst_15 [2] : vector<8x8x8xf32> to vector<8x8xf32>
    %72 = vector.shape_cast %71 : vector<8x8xf32> to vector<8x8x1xf32>
    %73 = vector.broadcast %72 : vector<8x8x1xf32> to vector<8x8x8xf32>
    %74 = arith.subf %70, %73 : vector<8x8x8xf32>
    %75 = math.exp %74 : vector<8x8x8xf32>
    %cst_16 = arith.constant dense<0.000000e+00> : vector<8x8xf32>
    %76 = vector.multi_reduction <add>, %75, %cst_16 [2] : vector<8x8x8xf32> to vector<8x8xf32>
    %77 = vector.shape_cast %76 : vector<8x8xf32> to vector<8x8x1xf32>
    %78 = tpu.reciprocal %77 {approx = true} : vector<8x8x1xf32> -> vector<8x8x1xf32>
    %79 = vector.broadcast %78 : vector<8x8x1xf32> to vector<8x8x8xf32>
    %80 = arith.mulf %75, %79 : vector<8x8x8xf32>
    %81 = arith.truncf %80 : vector<8x8x8xf32> to vector<8x8x8xbf16>
    "tpu.trace_start"() <{level = 10 : i32, message = "bqk,bkd->bqd"}> : () -> ()
    %cst_17 = arith.constant dense<0.000000e+00> : vector<8x8x8xf32>
    %82 = tpu.matmul %81, %61, %cst_17 {dimension_numbers = #tpu.dot_dimension_numbers<[2], [1], [1], [2], [0, 0, 0, 1, 1, 2], [0], [0]>} : vector<8x8x8xbf16>, vector<8x8x8xbf16>, vector<8x8x8xf32> -> vector<8x8x8xf32>
    "tpu.trace_stop"() : () -> ()
    %83 = vector.extract_strided_slice %82 {offsets = [0, 0, 0], sizes = [2, 8, 8], strides = [1, 1, 1]} : vector<8x8x8xf32> to vector<2x8x8xf32>
    %84 = vector.shape_cast %83 : vector<2x8x8xf32> to vector<16x8xf32>
    %85 = vector.extract_strided_slice %82 {offsets = [2, 0, 0], sizes = [2, 8, 8], strides = [1, 1, 1]} : vector<8x8x8xf32> to vector<2x8x8xf32>
    %86 = vector.shape_cast %85 : vector<2x8x8xf32> to vector<16x8xf32>
    %87 = vector.extract_strided_slice %82 {offsets = [4, 0, 0], sizes = [2, 8, 8], strides = [1, 1, 1]} : vector<8x8x8xf32> to vector<2x8x8xf32>
    %88 = vector.shape_cast %87 : vector<2x8x8xf32> to vector<16x8xf32>
    %89 = vector.extract_strided_slice %82 {offsets = [6, 0, 0], sizes = [2, 8, 8], strides = [1, 1, 1]} : vector<8x8x8xf32> to vector<2x8x8xf32>
    %90 = vector.shape_cast %89 : vector<2x8x8xf32> to vector<16x8xf32>
    %91 = tpu.concatenate %84, %86, %88, %90 in 1 : vector<16x8xf32>, vector<16x8xf32>, vector<16x8xf32>, vector<16x8xf32> -> vector<16x32xf32>
    %92 = arith.truncf %91 : vector<16x32xf32> to vector<16x32xbf16>
    %c0_18 = arith.constant 0 : index
    %c0_19 = arith.constant 0 : index
    %93 = vector.load %arg5[%c0_18, %c0_19] : memref<32x128xbf16, #tpu.memory_space<vmem>>, vector<32x128xbf16>
    %cst_20 = arith.constant dense<0.000000e+00> : vector<16x128xf32>
    %94 = tpu.matmul %92, %93, %cst_20 {dimension_numbers = #tpu.dot_dimension_numbers<[1], [0], [0], [1], [0, 0, 1, 1], [], []>} : vector<16x32xbf16>, vector<32x128xbf16>, vector<16x128xf32> -> vector<16x128xf32>
    %c0_21 = arith.constant 0 : index
    %c0_22 = arith.constant 0 : index
    %95 = vector.load %arg6[%c0_21, %c0_22] : memref<1x128xf32, #tpu.memory_space<vmem>>, vector<1x128xf32>
    %96 = vector.broadcast %95 : vector<1x128xf32> to vector<16x128xf32>
    %97 = arith.addf %94, %96 : vector<16x128xf32>
    %98 = arith.addf %1, %97 : vector<16x128xf32>
    %c0_23 = arith.constant 0 : index
    %c0_24 = arith.constant 0 : index
    %99 = vector.load %arg7[%c0_23, %c0_24] : memref<1x128xf32, #tpu.memory_space<vmem>>, vector<1x128xf32>
    %c0_25 = arith.constant 0 : index
    %c0_26 = arith.constant 0 : index
    %100 = vector.load %arg8[%c0_25, %c0_26] : memref<1x128xf32, #tpu.memory_space<vmem>>, vector<1x128xf32>
    %cst_27 = arith.constant dense<0.000000e+00> : vector<16xf32>
    %101 = vector.multi_reduction <add>, %98, %cst_27 [1] : vector<16x128xf32> to vector<16xf32>
    %102 = vector.shape_cast %101 : vector<16xf32> to vector<16x1xf32>
    %103 = arith.mulf %98, %98 : vector<16x128xf32>
    %cst_28 = arith.constant dense<0.000000e+00> : vector<16xf32>
    %104 = vector.multi_reduction <add>, %103, %cst_28 [1] : vector<16x128xf32> to vector<16xf32>
    %105 = vector.shape_cast %104 : vector<16xf32> to vector<16x1xf32>
    %cst_29 = arith.constant 3.125000e-02 : f32
    %106 = vector.broadcast %cst_29 : f32 to vector<16x1xf32>
    %107 = arith.mulf %102, %106 : vector<16x1xf32>
    %cst_30 = arith.constant 3.125000e-02 : f32
    %108 = vector.broadcast %cst_30 : f32 to vector<16x1xf32>
    %109 = arith.mulf %105, %108 : vector<16x1xf32>
    %110 = arith.mulf %107, %107 : vector<16x1xf32>
    %111 = arith.subf %109, %110 : vector<16x1xf32>
    %cst_31 = arith.constant 9.99999974E-6 : f32
    %112 = vector.broadcast %cst_31 : f32 to vector<16x1xf32>
    %113 = arith.addf %111, %112 : vector<16x1xf32>
    %114 = math.rsqrt %113 : vector<16x1xf32>
    %115 = vector.broadcast %107 : vector<16x1xf32> to vector<16x128xf32>
    %116 = arith.subf %98, %115 : vector<16x128xf32>
    %117 = vector.broadcast %114 : vector<16x1xf32> to vector<16x128xf32>
    %118 = arith.mulf %116, %117 : vector<16x128xf32>
    %119 = vector.broadcast %99 : vector<1x128xf32> to vector<16x128xf32>
    %120 = arith.mulf %118, %119 : vector<16x128xf32>
    %121 = vector.broadcast %100 : vector<1x128xf32> to vector<16x128xf32>
    %122 = arith.addf %120, %121 : vector<16x128xf32>
    %123 = arith.truncf %122 : vector<16x128xf32> to vector<16x128xbf16>
    %c0_32 = arith.constant 0 : index
    %c0_33 = arith.constant 0 : index
    %124 = vector.load %arg9[%c0_32, %c0_33] : memref<128x128xbf16, #tpu.memory_space<vmem>>, vector<128x128xbf16>
    %cst_34 = arith.constant dense<0.000000e+00> : vector<16x128xf32>
    %125 = tpu.matmul %123, %124, %cst_34 {dimension_numbers = #tpu.dot_dimension_numbers<[1], [0], [0], [1], [0, 0, 1, 1], [], []>} : vector<16x128xbf16>, vector<128x128xbf16>, vector<16x128xf32> -> vector<16x128xf32>
    %c0_35 = arith.constant 0 : index
    %c0_36 = arith.constant 0 : index
    %126 = vector.load %arg10[%c0_35, %c0_36] : memref<1x128xf32, #tpu.memory_space<vmem>>, vector<1x128xf32>
    %127 = vector.broadcast %126 : vector<1x128xf32> to vector<16x128xf32>
    %128 = arith.addf %125, %127 : vector<16x128xf32>
    %cst_37 = arith.constant 0.000000e+00 : f32
    %129 = vector.broadcast %cst_37 : f32 to vector<16x128xf32>
    %130 = arith.maximumf %128, %129 : vector<16x128xf32>
    %131 = arith.truncf %130 : vector<16x128xf32> to vector<16x128xbf16>
    %c0_38 = arith.constant 0 : index
    %c0_39 = arith.constant 0 : index
    %132 = vector.load %arg11[%c0_38, %c0_39] : memref<128x128xbf16, #tpu.memory_space<vmem>>, vector<128x128xbf16>
    %cst_40 = arith.constant dense<0.000000e+00> : vector<16x128xf32>
    %133 = tpu.matmul %131, %132, %cst_40 {dimension_numbers = #tpu.dot_dimension_numbers<[1], [0], [0], [1], [0, 0, 1, 1], [], []>} : vector<16x128xbf16>, vector<128x128xbf16>, vector<16x128xf32> -> vector<16x128xf32>
    %c0_41 = arith.constant 0 : index
    %c0_42 = arith.constant 0 : index
    %134 = vector.load %arg12[%c0_41, %c0_42] : memref<1x128xf32, #tpu.memory_space<vmem>>, vector<1x128xf32>
    %135 = vector.broadcast %134 : vector<1x128xf32> to vector<16x128xf32>
    %136 = arith.addf %133, %135 : vector<16x128xf32>
    %137 = arith.addf %98, %136 : vector<16x128xf32>
    %138 = vector.shape_cast %137 : vector<16x128xf32> to vector<2x8x128xf32>
    %c0_43 = arith.constant 0 : index
    %c0_44 = arith.constant 0 : index
    %c0_45 = arith.constant 0 : index
    %139 = vector.load %arg13[%c0_43, %c0_44, %c0_45] : memref<2x8x128xf32, #tpu.memory_space<vmem>>, vector<2x8x128xf32>
    tpu.vector_store %arg13[%c0_43, %c0_44, %c0_45], %138 {strides = array<i32>} : memref<2x8x128xf32, #tpu.memory_space<vmem>>, vector<2x8x128xf32>,
    return
  }
  func.func @transform_0(%arg0: i32) -> (i32, i32, i32) {
    %c0_i32 = arith.constant 0 : i32
    %c0_i32_0 = arith.constant 0 : i32
    %c0_i32_1 = arith.constant 0 : i32
    return %arg0, %c0_i32, %c0_i32_0 : i32, i32, i32
  }
  func.func @transform_1(%arg0: i32) -> (i32, i32) {
    %c0_i32 = arith.constant 0 : i32
    %c0_i32_0 = arith.constant 0 : i32
    %c0_i32_1 = arith.constant 0 : i32
    return %c0_i32, %c0_i32_0 : i32, i32
  }
  func.func @transform_2(%arg0: i32) -> (i32, i32) {
    %c0_i32 = arith.constant 0 : i32
    %c0_i32_0 = arith.constant 0 : i32
    %c0_i32_1 = arith.constant 0 : i32
    return %c0_i32, %c0_i32_0 : i32, i32
  }
  func.func @transform_3(%arg0: i32) -> (i32, i32) {
    %c0_i32 = arith.constant 0 : i32
    %c0_i32_0 = arith.constant 0 : i32
    %c0_i32_1 = arith.constant 0 : i32
    return %c0_i32, %c0_i32_0 : i32, i32
  }
  func.func @transform_4(%arg0: i32) -> (i32, i32) {
    %c0_i32 = arith.constant 0 : i32
    %c0_i32_0 = arith.constant 0 : i32
    %c0_i32_1 = arith.constant 0 : i32
    return %c0_i32, %c0_i32_0 : i32, i32
  }
  func.func @transform_5(%arg0: i32) -> (i32, i32) {
    %c0_i32 = arith.constant 0 : i32
    %c0_i32_0 = arith.constant 0 : i32
    %c0_i32_1 = arith.constant 0 : i32
    return %c0_i32, %c0_i32_0 : i32, i32
  }
  func.func @transform_6(%arg0: i32) -> (i32, i32) {
    %c0_i32 = arith.constant 0 : i32
    %c0_i32_0 = arith.constant 0 : i32
    %c0_i32_1 = arith.constant 0 : i32
    return %c0_i32, %c0_i32_0 : i32, i32
  }
  func.func @transform_7(%arg0: i32) -> (i32, i32) {
    %c0_i32 = arith.constant 0 : i32
    %c0_i32_0 = arith.constant 0 : i32
    %c0_i32_1 = arith.constant 0 : i32
    return %c0_i32, %c0_i32_0 : i32, i32
  }
  func.func @transform_8(%arg0: i32) -> (i32, i32) {
    %c0_i32 = arith.constant 0 : i32
    %c0_i32_0 = arith.constant 0 : i32
    %c0_i32_1 = arith.constant 0 : i32
    return %c0_i32, %c0_i32_0 : i32, i32
  }
  func.func @transform_9(%arg0: i32) -> (i32, i32) {
    %c0_i32 = arith.constant 0 : i32
    %c0_i32_0 = arith.constant 0 : i32
    %c0_i32_1 = arith.constant 0 : i32
    return %c0_i32, %c0_i32_0 : i32, i32
  }
  func.func @transform_10(%arg0: i32) -> (i32, i32) {
    %c0_i32 = arith.constant 0 : i32
    %c0_i32_0 = arith.constant 0 : i32
    %c0_i32_1 = arith.constant 0 : i32
    return %c0_i32, %c0_i32_0 : i32, i32
  }
  func.func @transform_11(%arg0: i32) -> (i32, i32) {
    %c0_i32 = arith.constant 0 : i32
    %c0_i32_0 = arith.constant 0 : i32
    %c0_i32_1 = arith.constant 0 : i32
    return %c0_i32, %c0_i32_0 : i32, i32
  }
  func.func @transform_12(%arg0: i32) -> (i32, i32, i32) {
    %c0_i32 = arith.constant 0 : i32
    %c0_i32_0 = arith.constant 0 : i32
    %c0_i32_1 = arith.constant 0 : i32
    return %arg0, %c0_i32, %c0_i32_0 : i32, i32, i32
  }
}

</mosaic_0001>

<bundles_post_ra>
// kernel: tpu_custom_call.1
= control target key start
LH: loop header
LB: loop body
LE: loop exit
PB: predicated region body
PF: predicated region fallthrough
CT: control target
= control target key end

     0   :  { %17 = vsyncpa [#allocation3], 0  ;;  %s3105_s0 = inlined_call_operand.hbm [shape: f32[2,8,128], index: 0, kind: input, shape index: {}]   ;;  %s3106_s1 = inlined_call_operand.hbm [shape: f32[1,128], index: 1, kind: input, shape index: {}]   ;;  %s3107_s2 = inlined_call_operand.hbm [shape: f32[1,128], index: 2, kind: input, shape index: {}]   ;;  %s3108_s3 = inlined_call_operand.hbm [shape: bf16[128,384], index: 3, kind: input, shape index: {}]   ;;  %s3109_s4 = inlined_call_operand.hbm [shape: bf16[32,128], index: 4, kind: input, shape index: {}]   ;;  %s3110_s5 = inlined_call_operand.hbm [shape: f32[1,128], index: 5, kind: input, shape index: {}]   ;;  %s3111_s6 = inlined_call_operand.hbm [shape: f32[1,128], index: 6, kind: input, shape index: {}]   ;;  %s3112_s7 = inlined_call_operand.hbm [shape: f32[1,128], index: 7, kind: input, shape index: {}]   ;;  %s3113_s8 = inlined_call_operand.hbm [shape: bf16[128,128], index: 8, kind: input, shape index: {}]   ;;  %s3114_s9 = inlined_call_operand.hbm [shape: f32[1,128], index: 9, kind: input, shape index: {}]   ;;  %s3115_s10 = inlined_call_operand.hbm [shape: bf16[128,128], index: 10, kind: input, shape index: {}]   ;;  %s3116_s11 = inlined_call_operand.hbm [shape: f32[1,128], index: 11, kind: input, shape index: {}]   ;;  %s3117_s12 = inlined_call_operand.hbm [shape: f32[2,8,128], index: 12, kind: output, shape index: {}]  }
   0x1   :  { %18 = vsyncpa [#allocation6], 0 }
   0x2   :  { %19 = vsyncpa [#allocation9], 0 }
   0x3   :  { %20 = vsyncpa [#allocation12], 0 }
   0x4   :  { %21 = vsyncpa [#allocation15], 0 }
   0x5   :  { %22 = vsyncpa [#allocation18], 0 }
   0x6   :  { %23 = vsyncpa [#allocation21], 0 }
   0x7   :  { %24 = vsyncpa [#allocation4], 0  ;;  %s2591_s21 = smov [#allocation5]   ;;  %s2592_s23 = smov [#allocation8]  }
   0x8   :  { %s43_s22 = sshll.u32 %s2591_s21, 4  ;;  %s62_s24 = sshll.u32 %s2592_s23, 4  ;;  %s44_s22 = int_to_ptr.vmem [resolvable:$true] %s43_s22  ;;  %s2683_s24 = int_to_ptr.vmem [resolvable:$true] %s62_s24 }
   0x9   :  { %s2289_s27 = scalar_lea.hbm %s3106_s1, 16 }
   0xa   :  { %p2290_p0 = scmp.ne.s32.totalorder %s3106_s1, %s2289_s27  ;;  %p2293_p1 = scmp.lt.u32.totalorder %s2289_s27, %s3106_s1 }
   0xc   :  { %p2295_p2 = pnand %p2293_p1, %p2290_p0 }
   0xe   :  { %2298 = shalt.err (!%p2295_p2)
}
   0xf   :  { %s2299_s14 = scalar_lea.vmem %s44_s22, 16  ;;  %s2303_s15 = scalar_lea.vmem %s44_s22, 32 }
  0x10   :  { %p2300_p3 = scmp.ne.s32.totalorder %s44_s22, %s2299_s14  ;;  %p2304_p4 = scmp.lt.s32.totalorder %s44_s22, %s44_s22 }
  0x11   :  { %p2305_p5 = scmp.lt.s32.totalorder %s2303_s15, %s2299_s14 }
  0x13   :  { %p2306_p6 = por %p2305_p5, %p2304_p4 }
  0x15   :  { %p2307_p7 = pnand %p2306_p6, %p2300_p3 }
  0x17   :  { %2310 = shalt.err (!%p2307_p7)
}
  0x18   :  { %46 = dma.hbm_to_vmem [thread:$0]  %s3106_s1, 16, %s44_s22, [#allocation6]  }
  0x19   :  { %s2311_s20 = scalar_lea.hbm %s3108_s3, 3072 }
  0x1a   :  { %p2312_p8 = scmp.ne.s32.totalorder %s3108_s3, %s2311_s20  ;;  %p2315_p9 = scmp.lt.u32.totalorder %s2311_s20, %s3108_s3 }
  0x1c   :  { %p2317_p10 = pnand %p2315_p9, %p2312_p8 }
  0x1e   :  { %2320 = shalt.err (!%p2317_p10)
}
  0x1f   :  { %s2321_s27 = scalar_lea.vmem %s2683_s24, 3072  ;;  %p2326_p12 = scmp.lt.s32.totalorder %s2683_s24, %s2683_s24 }
  0x20   :  { %p2322_p11 = scmp.ne.s32.totalorder %s2683_s24, %s2321_s27  ;;  %p2327_p13 = scmp.lt.s32.totalorder %s2321_s27, %s2321_s27 }
  0x22   :  { %p2328_p0 = por %p2327_p13, %p2326_p12 }
  0x24   :  { %p2329_p1 = pnand %p2328_p0, %p2322_p11 }
  0x26   :  { %2332 = shalt.err (!%p2329_p1)
}
  0x27   :  { %s2593_s1 = smov 192   ;;  %s2594_s22 = smov 12  }
  0x28   :  { %68 = dma.hbm_to_vmem [thread:$0]  %s3108_s3, 3072, %s2683_s24, [#allocation9], %s2593_s1, %s2593_s1, %s2594_s22  }
  0x29   :  { %s2595_s30 = smov [#allocation11]   ;;  %s2596_s14 = smov [#allocation14]  }
  0x2a   :  { %s87_s13 = sshll.u32 %s2595_s30, 4  ;;  %s107_s15 = sshll.u32 %s2596_s14, 4  ;;  %s88_s13 = int_to_ptr.vmem [resolvable:$true] %s87_s13  ;;  %s108_s15 = int_to_ptr.vmem [resolvable:$true] %s107_s15 }
  0x2b   :  { %s2333_s18 = scalar_lea.hbm %s3110_s5, 16 }
  0x2c   :  { %p2334_p2 = scmp.ne.s32.totalorder %s3110_s5, %s2333_s18  ;;  %p2337_p3 = scmp.lt.u32.totalorder %s2333_s18, %s3110_s5 }
  0x2e   :  { %p2339_p4 = pnand %p2337_p3, %p2334_p2 }
  0x30   :  { %2342 = shalt.err (!%p2339_p4)
}
  0x31   :  { %s2343_s3 = scalar_lea.vmem %s88_s13, 16  ;;  %s2347_s24 = scalar_lea.vmem %s88_s13, 32 }
  0x32   :  { %p2344_p5 = scmp.ne.s32.totalorder %s88_s13, %s2343_s3  ;;  %p2348_p6 = scmp.lt.s32.totalorder %s88_s13, %s88_s13 }
  0x33   :  { %p2349_p7 = scmp.lt.s32.totalorder %s2347_s24, %s2343_s3 }
  0x35   :  { %p2350_p8 = por %p2349_p7, %p2348_p6 }
  0x37   :  { %p2351_p9 = pnand %p2350_p8, %p2344_p5 }
  0x39   :  { %2354 = shalt.err (!%p2351_p9)
}
  0x3a   :  { %90 = dma.hbm_to_vmem [thread:$0]  %s3110_s5, 16, %s88_s13, [#allocation12]  }
  0x3b   :  { %s2355_s22 = scalar_lea.hbm %s3112_s7, 16 }
  0x3c   :  { %p2356_p10 = scmp.ne.s32.totalorder %s3112_s7, %s2355_s22  ;;  %p2359_p11 = scmp.lt.u32.totalorder %s2355_s22, %s3112_s7 }
  0x3e   :  { %p2361_p12 = pnand %p2359_p11, %p2356_p10 }
  0x40   :  { %2364 = shalt.err (!%p2361_p12)
}
  0x41   :  { %s2365_s16 = scalar_lea.vmem %s108_s15, 16  ;;  %s2369_s17 = scalar_lea.vmem %s108_s15, 32 }
  0x42   :  { %p2366_p13 = scmp.ne.s32.totalorder %s108_s15, %s2365_s16  ;;  %p2370_p0 = scmp.lt.s32.totalorder %s108_s15, %s108_s15 }
  0x43   :  { %p2371_p1 = scmp.lt.s32.totalorder %s2369_s17, %s2365_s16 }
  0x45   :  { %p2372_p2 = por %p2371_p1, %p2370_p0 }
  0x47   :  { %p2373_p3 = pnand %p2372_p2, %p2366_p13 }
  0x49   :  { %2376 = shalt.err (!%p2373_p3)
}
  0x4a   :  { %110 = dma.hbm_to_vmem [thread:$0]  %s3112_s7, 16, %s108_s15, [#allocation15]  }
  0x4b   :  { %s2597_s18 = smov [#allocation17]   ;;  %s2598_s20 = smov [#allocation2]  }
  0x4c   :  { %s129_s19 = sshll.u32 %s2597_s18, 4  ;;  %s30_s21 = sshll.u32 %s2598_s20, 4  ;;  %s130_s19 = int_to_ptr.vmem [resolvable:$true] %s129_s19  ;;  %s2738_s21 = int_to_ptr.vmem [resolvable:$true] %s30_s21 }
  0x4d   :  { %s2377_s24 = scalar_lea.hbm %s3114_s9, 16 }
  0x4e   :  { %p2378_p4 = scmp.ne.s32.totalorder %s3114_s9, %s2377_s24  ;;  %p2381_p5 = scmp.lt.u32.totalorder %s2377_s24, %s3114_s9 }
  0x50   :  { %p2383_p6 = pnand %p2381_p5, %p2378_p4 }
  0x52   :  { %2386 = shalt.err (!%p2383_p6)
}
  0x53   :  { %s2387_s7 = scalar_lea.vmem %s130_s19, 16  ;;  %s2391_s15 = scalar_lea.vmem %s130_s19, 32 }
  0x54   :  { %p2388_p7 = scmp.ne.s32.totalorder %s130_s19, %s2387_s7  ;;  %p2392_p8 = scmp.lt.s32.totalorder %s130_s19, %s130_s19 }
  0x55   :  { %p2393_p9 = scmp.lt.s32.totalorder %s2391_s15, %s2387_s7 }
  0x57   :  { %p2394_p10 = por %p2393_p9, %p2392_p8 }
  0x59   :  { %p2395_p11 = pnand %p2394_p10, %p2388_p7 }
  0x5b   :  { %2398 = shalt.err (!%p2395_p11)
}
  0x5c   :  { %132 = dma.hbm_to_vmem [thread:$0]  %s3114_s9, 16, %s130_s19, [#allocation18]  }
  0x5d   :  { %s2399_s14 = scalar_lea.hbm %s3105_s0, 256 }
  0x5e   :  { %p2400_p12 = scmp.ne.s32.totalorder %s3105_s0, %s2399_s14  ;;  %p2403_p13 = scmp.lt.u32.totalorder %s2399_s14, %s3105_s0 }
  0x60   :  { %p2405_p0 = pnand %p2403_p13, %p2400_p12 }
  0x62   :  { %2408 = shalt.err (!%p2405_p0)
}
  0x63   :  { %s2409_s18 = scalar_lea.vmem %s2738_s21, 256  ;;  %p2414_p2 = scmp.lt.s32.totalorder %s2738_s21, %s2738_s21 }
  0x64   :  { %p2410_p1 = scmp.ne.s32.totalorder %s2738_s21, %s2409_s18  ;;  %p2415_p3 = scmp.lt.s32.totalorder %s2409_s18, %s2409_s18 }
  0x66   :  { %p2416_p4 = por %p2415_p3, %p2414_p2 }
  0x68   :  { %p2417_p5 = pnand %p2416_p4, %p2410_p1 }
  0x6a   :  { %2420 = shalt.err (!%p2417_p5)
}
  0x6b   :  { %s2599_s9 = smov 128   ;;  %s2600_s19 = smov 8  }
  0x6c   :  { %36 = dma.hbm_to_vmem [thread:$0]  %s3105_s0, 256, %s2738_s21, [#allocation3], %s2599_s9, %s2599_s9, %s2600_s19  }
  0x6d   :  { %s2601_s3 = smov [#allocation7]   ;;  %s2602_s25 = smov [#allocation10]  }
  0x6e   :  { %s53_s24 = sshll.u32 %s2601_s3, 4  ;;  %s74_s26 = sshll.u32 %s2602_s25, 4  ;;  %s54_s24 = int_to_ptr.vmem [resolvable:$true] %s53_s24  ;;  %s2772_s26 = int_to_ptr.vmem [resolvable:$true] %s74_s26 }
  0x6f   :  { %s2421_s7 = scalar_lea.hbm %s3107_s2, 16 }
  0x70   :  { %p2422_p6 = scmp.ne.s32.totalorder %s3107_s2, %s2421_s7  ;;  %p2425_p7 = scmp.lt.u32.totalorder %s2421_s7, %s3107_s2 }
  0x72   :  { %p2427_p8 = pnand %p2425_p7, %p2422_p6 }
  0x74   :  { %2430 = shalt.err (!%p2427_p8)
}
  0x75   :  { %s2431_s0 = scalar_lea.vmem %s54_s24, 16  ;;  %s2435_s21 = scalar_lea.vmem %s54_s24, 32 }
  0x76   :  { %p2432_p9 = scmp.ne.s32.totalorder %s54_s24, %s2431_s0  ;;  %p2436_p10 = scmp.lt.s32.totalorder %s54_s24, %s54_s24 }
  0x77   :  { %p2437_p11 = scmp.lt.s32.totalorder %s2435_s21, %s2431_s0 }
  0x79   :  { %p2438_p12 = por %p2437_p11, %p2436_p10 }
  0x7b   :  { %p2439_p13 = pnand %p2438_p12, %p2432_p9 }
  0x7d   :  { %2442 = shalt.err (!%p2439_p13)
}
  0x7e   :  { %56 = dma.hbm_to_vmem [thread:$0]  %s3107_s2, 16, %s54_s24, [#allocation6]  }
  0x7f   :  { %s2443_s5 = scalar_lea.hbm %s3109_s4, 256 }
  0x80   :  { %p2444_p0 = scmp.ne.s32.totalorder %s3109_s4, %s2443_s5  ;;  %p2447_p1 = scmp.lt.u32.totalorder %s2443_s5, %s3109_s4 }
  0x82   :  { %p2449_p2 = pnand %p2447_p1, %p2444_p0 }
  0x84   :  { %2452 = shalt.err (!%p2449_p2)
}
  0x85   :  { %s2453_s3 = scalar_lea.vmem %s2772_s26, 256  ;;  %p2458_p4 = scmp.lt.s32.totalorder %s2772_s26, %s2772_s26 }
  0x86   :  { %p2454_p3 = scmp.ne.s32.totalorder %s2772_s26, %s2453_s3  ;;  %p2459_p5 = scmp.lt.s32.totalorder %s2453_s3, %s2453_s3 }
  0x88   :  { %p2460_p6 = por %p2459_p5, %p2458_p4 }
  0x8a   :  { %p2461_p7 = pnand %p2460_p6, %p2454_p3 }
  0x8c   :  { %2464 = shalt.err (!%p2461_p7)
}
  0x8d   :  { %s2603_s2 = smov 64   ;;  %s2604_s24 = smov 4  }
  0x8e   :  { %80 = dma.hbm_to_vmem [thread:$0]  %s3109_s4, 256, %s2772_s26, [#allocation9], %s2603_s2, %s2603_s2, %s2604_s24  }
  0x8f   :  { %s2605_s1 = smov [#allocation13]   ;;  %s2606_s15 = smov [#allocation16]  }
  0x90   :  { %s97_s7 = sshll.u32 %s2605_s1, 4  ;;  %s116_s22 = sshll.u32 %s2606_s15, 4  ;;  %s98_s7 = int_to_ptr.vmem [resolvable:$true] %s97_s7  ;;  %s2806_s22 = int_to_ptr.vmem [resolvable:$true] %s116_s22 }
  0x91   :  { %s2465_s0 = scalar_lea.hbm %s3111_s6, 16 }
  0x92   :  { %p2466_p8 = scmp.ne.s32.totalorder %s3111_s6, %s2465_s0  ;;  %p2469_p9 = scmp.lt.u32.totalorder %s2465_s0, %s3111_s6 }
  0x94   :  { %p2471_p10 = pnand %p2469_p9, %p2466_p8 }
  0x96   :  { %2474 = shalt.err (!%p2471_p10)
}
  0x97   :  { %s2475_s4 = scalar_lea.vmem %s98_s7, 16  ;;  %s2479_s26 = scalar_lea.vmem %s98_s7, 32 }
  0x98   :  { %p2476_p11 = scmp.ne.s32.totalorder %s98_s7, %s2475_s4  ;;  %p2480_p12 = scmp.lt.s32.totalorder %s98_s7, %s98_s7 }
  0x99   :  { %p2481_p13 = scmp.lt.s32.totalorder %s2479_s26, %s2475_s4 }
  0x9b   :  { %p2482_p0 = por %p2481_p13, %p2480_p12 }
  0x9d   :  { %p2483_p1 = pnand %p2482_p0, %p2476_p11 }
  0x9f   :  { %2486 = shalt.err (!%p2483_p1)
}
  0xa0   :  { %100 = dma.hbm_to_vmem [thread:$0]  %s3111_s6, 16, %s98_s7, [#allocation12]  }
  0xa1   :  { %s2487_s20 = scalar_lea.hbm %s3113_s8, 1024 }
  0xa2   :  { %p2488_p2 = scmp.ne.s32.totalorder %s3113_s8, %s2487_s20  ;;  %p2491_p3 = scmp.lt.u32.totalorder %s2487_s20, %s3113_s8 }
  0xa4   :  { %p2493_p4 = pnand %p2491_p3, %p2488_p2 }
  0xa6   :  { %2496 = shalt.err (!%p2493_p4)
}
  0xa7   :  { %s2497_s1 = scalar_lea.vmem %s2806_s22, 1024  ;;  %p2502_p6 = scmp.lt.s32.totalorder %s2806_s22, %s2806_s22 }
  0xa8   :  { %p2498_p5 = scmp.ne.s32.totalorder %s2806_s22, %s2497_s1  ;;  %p2503_p7 = scmp.lt.s32.totalorder %s2497_s1, %s2497_s1 }
  0xaa   :  { %p2504_p8 = por %p2503_p7, %p2502_p6 }
  0xac   :  { %p2505_p9 = pnand %p2504_p8, %p2498_p5 }
  0xae   :  { %2508 = shalt.err (!%p2505_p9)
}
  0xaf   :  { %122 = dma.hbm_to_vmem [thread:$0]  %s3113_s8, 1024, %s2806_s22, [#allocation15], %s2603_s2, %s2603_s2, %s2604_s24  }
  0xb0   :  { %s2607_s15 = smov [#allocation19]   ;;  %s2608_s29 = smov [#allocation20]  }
  0xb1   :  { %s138_s28 = sshll.u32 %s2607_s15, 4  ;;  %s151_s0 = sshll.u32 %s2608_s29, 4  ;;  %s139_s28 = int_to_ptr.vmem [resolvable:$true] %s138_s28  ;;  %s152_s0 = int_to_ptr.vmem [resolvable:$true] %s151_s0 }
  0xb2   :  { %s2509_s14 = scalar_lea.hbm %s3115_s10, 1024 }
  0xb3   :  { %p2510_p10 = scmp.ne.s32.totalorder %s3115_s10, %s2509_s14  ;;  %p2513_p11 = scmp.lt.u32.totalorder %s2509_s14, %s3115_s10 }
  0xb5   :  { %p2515_p12 = pnand %p2513_p11, %p2510_p10 }
  0xb7   :  { %2518 = shalt.err (!%p2515_p12)
}
  0xb8   :  { %s2519_s8 = scalar_lea.vmem %s139_s28, 1024  ;;  %p2524_p0 = scmp.lt.s32.totalorder %s139_s28, %s139_s28 }
  0xb9   :  { %p2520_p13 = scmp.ne.s32.totalorder %s139_s28, %s2519_s8  ;;  %p2525_p1 = scmp.lt.s32.totalorder %s2519_s8, %s2519_s8 }
  0xbb   :  { %p2526_p2 = por %p2525_p1, %p2524_p0 }
  0xbd   :  { %p2527_p3 = pnand %p2526_p2, %p2520_p13 }
  0xbf   :  { %2530 = shalt.err (!%p2527_p3)
}
  0xc0   :  { %144 = dma.hbm_to_vmem [thread:$0]  %s3115_s10, 1024, %s139_s28, [#allocation18], %s2603_s2, %s2603_s2, %s2604_s24  }
  0xc1   :  { %s2531_s20 = scalar_lea.hbm %s3116_s11, 16 }
  0xc2   :  { %p2532_p4 = scmp.ne.s32.totalorder %s3116_s11, %s2531_s20  ;;  %p2535_p5 = scmp.lt.u32.totalorder %s2531_s20, %s3116_s11 }
  0xc4   :  { %p2537_p6 = pnand %p2535_p5, %p2532_p4 }
  0xc6   :  { %2540 = shalt.err (!%p2537_p6)
}
  0xc7   :  { %s2541_s1 = scalar_lea.vmem %s152_s0, 16  ;;  %s2545_s6 = scalar_lea.vmem %s152_s0, 32 }
  0xc8   :  { %p2542_p7 = scmp.ne.s32.totalorder %s152_s0, %s2541_s1  ;;  %p2546_p8 = scmp.lt.s32.totalorder %s152_s0, %s152_s0 }
  0xc9   :  { %p2547_p9 = scmp.lt.s32.totalorder %s2545_s6, %s2541_s1 }
  0xcb   :  { %p2548_p10 = por %p2547_p9, %p2546_p8 }
  0xcd   :  { %p2549_p11 = pnand %p2548_p10, %p2542_p7 }
  0xcf   :  { %2552 = shalt.err (!%p2549_p11)
}
  0xd0   :  { %154 = dma.hbm_to_vmem [thread:$0]  %s3116_s11, 16, %s152_s0, [#allocation21]  }
  0xd1   :  { %2575 = dma.done.wait [#allocation3], 256  }
  0xd2   :  { %2576 = vsyncadd [#allocation3], 4294967040 }
  0xd3   :  { %2577 = dma.done.wait [#allocation6], 32  }
  0xd4   :  { %2578 = vsyncadd [#allocation6], 4294967264 }
  0xd5   :  { %2579 = dma.done.wait [#allocation9], 3328  }
  0xd6   :  { %2580 = vsyncadd [#allocation9], 4294963968 }
  0xd7   :  { %2581 = dma.done.wait [#allocation12], 32  }
  0xd8   :  { %2582 = vsyncadd [#allocation12], 4294967264 }
  0xd9   :  { %2583 = dma.done.wait [#allocation15], 1040  }
  0xda   :  { %2584 = vsyncadd [#allocation15], 4294966256 }
  0xdb   :  { %2585 = dma.done.wait [#allocation18], 1040  }
  0xdc   :  { %2586 = vsyncadd [#allocation18], 4294966256 }
  0xdd   :  { %2587 = dma.done.wait [#allocation21], 16  }
  0xde   :  { %2588 = vsyncadd [#allocation21], 4294967280  ;;  %v2609_v0 = vmov 0.0   ;;  %v2868_v1 = vld [vmem:[#allocation2] sm:$0xff]  ;;  %v2870_v2 = vld [vmem:[#allocation2 + $0x8] sm:$0xff]  ;;  %v2610_v24 = vmov 0  }
  0xdf   :  { %1946 = vmatprep.subr.bf16.mxu1 %v2609_v0  ;;  %196 = vadd.xlane.f32.xlu0 %v2868_v1  ;;  %v200_v3 = vmul.f32 %v2868_v1, %v2868_v1  ;;  %v2197_v4 = vld [vmem:[#allocation8 + $0x4] ss:$12 sps:$4 sm:$0xff]   ;;  %v201_v5 = vmul.f32 %v2870_v2, %v2870_v2  ;;  %v2199_v6 = vld [vmem:[#allocation8] ss:$12 sps:$4 sm:$0xff]   ;;  %v2200_v7 = vld [vmem:[#allocation8 + $0x8] ss:$12 sps:$4 sm:$0xff]  }
  0xe0   :  { %399 = vmatprep.subr.bf16.mxu0 %v2197_v4  ;;  %1947 = vmatpush3.bf16.msra.mxu1 %v2200_v7  ;;  %v2201_v8 = vld [vmem:[#allocation8 + $0x1c] ss:$12 sps:$4 sm:$0xff]   ;;  %v2203_v9 = vld [vmem:[#allocation8 + $0x18] ss:$12 sps:$4 sm:$0xff]   ;;  %v2204_v10 = vld [vmem:[#allocation8 + $0x20] ss:$12 sps:$4 sm:$0xff]  }
  0xe1   :  { %202 = vadd.xlane.f32.xlu1 %v200_v3  ;;  %400 = vmatpush1.bf16.msra.mxu0 %v2199_v6  ;;  %v2205_v11 = vld [vmem:[#allocation8 + $0x34] ss:$12 sps:$4 sm:$0xff]   ;;  %v2207_v12 = vld [vmem:[#allocation8 + $0x30] ss:$12 sps:$4 sm:$0xff]   ;;  %v2208_v13 = vld [vmem:[#allocation8 + $0x38] ss:$12 sps:$4 sm:$0xff]  }
  0xe2   :  { %1948 = vmatprep.subr.bf16.mxu1 %v2609_v0  ;;  %401 = vmatprep.subr.bf16.mxu0 %v2201_v8  ;;  %v2209_v14 = vld [vmem:[#allocation8 + $0x4c] ss:$12 sps:$4 sm:$0xff]   ;;  %v2211_v15 = vld [vmem:[#allocation8 + $0x48] ss:$12 sps:$4 sm:$0xff]   ;;  %v2212_v16 = vld [vmem:[#allocation8 + $0x50] ss:$12 sps:$4 sm:$0xff]  }
  0xe3   :  { %198 = vadd.xlane.f32.xlu0 %v2870_v2  ;;  %v2213_v17 = vld [vmem:[#allocation8 + $0x64] ss:$12 sps:$4 sm:$0xff]   ;;  %v2215_v18 = vld [vmem:[#allocation8 + $0x60] ss:$12 sps:$4 sm:$0xff]   ;;  %v2216_v19 = vld [vmem:[#allocation8 + $0x68] ss:$12 sps:$4 sm:$0xff]   ;;  %431 = vmatprep.mubr.bf16.mxu0 %v2610_v24 }
  0xe4   :  { %1949 = vmatpush3.bf16.msra.mxu1 %v2204_v10  ;;  %v2217_v20 = vld [vmem:[#allocation8 + $0x7c] ss:$12 sps:$4 sm:$0xff]   ;;  %v2219_v21 = vld [vmem:[#allocation8 + $0x78] ss:$12 sps:$4 sm:$0xff]   ;;  %v2220_v22 = vld [vmem:[#allocation8 + $0x80] ss:$12 sps:$4 sm:$0xff]  }
  0xe5   :  { %204 = vadd.xlane.f32.xlu1 %v201_v5  ;;  %402 = vmatpush1.bf16.msra.mxu0 %v2203_v9  ;;  %v2221_v23 = vld [vmem:[#allocation8 + $0x94] ss:$12 sps:$4 sm:$0xff]   ;;  %vm2611_vm0 = vmmov 0   ;;  %v2223_v25 = vld [vmem:[#allocation8 + $0x90] ss:$12 sps:$4 sm:$0xff]   ;;  %vm567_vm1 = vcmask 64512  }
  0xe6   :  { %1950 = vmatprep.subr.bf16.mxu1 %v2609_v0  ;;  %403 = vmatprep.subr.bf16.mxu0 %v2205_v11  ;;  %v2224_v26 = vld [vmem:[#allocation8 + $0x98] ss:$12 sps:$4 sm:$0xff]   ;;  %v2227_v28 = vld [vmem:[#allocation8 + $0xa8] ss:$12 sps:$4 sm:$0xff]   ;;  %v2228_v29 = vld [vmem:[#allocation8 + $0xb0] ss:$12 sps:$4 sm:$0xff]  }
  0xe7   :  { %1962 = vmatprep.mubr.msk.bf16.mxu1 %vm2611_vm0, %v2609_v0  ;;  %v2225_v27 = vld [vmem:[#allocation8 + $0xac] ss:$12 sps:$4 sm:$0xff]   ;;  %v1818_v47 = vld [vmem:[#allocation5] ss:$0 sm:$0xff]  ;;  %v1819_v52 = vld [vmem:[#allocation7] ss:$0 sm:$0xff] }
  0xe8   :  { %1951 = vmatpush3.bf16.msra.mxu1 %v2208_v13  ;;  %s2612_s11 = smov 120   ;;  %s2613_s24 = smov 112   ;;  %vm1050_vm2 = vcmask 1043456   ;;  %vm1442_vm4 = vcmask 130048   ;;  %vm1445_vm5 = vcmask 195584   ;;  %vm1472_vm6 = vcmask 261120  }
  0xe9   :  { %404 = vmatpush1.bf16.msra.mxu0 %v2207_v12  ;;  %1952 = vmatprep.subr.bf16.mxu1 %v2609_v0  ;;  %s2614_s7 = smov 104   ;;  %s2615_s15 = smov 16  }
  0xea   :  { %405 = vmatprep.subr.bf16.mxu0 %v2209_v14  ;;  %s2616_s28 = smov 24   ;;  %s2617_s29 = smov [#allocation22]  }
  0xeb   :  { %s1800_s0 = sshll.u32 %s2617_s29, 4  ;;  %s1801_s0 = int_to_ptr.vmem [resolvable:$true] %s1800_s0 }
  0xec   :  { %1953 = vmatpush3.bf16.msra.mxu1 %v2212_v16  ;;  %s2553_s21 = scalar_lea.vmem %s1801_s0, 256  ;;  %p2558_p13 = scmp.lt.s32.totalorder %s1801_s0, %s1801_s0 }
  0xed   :  { %406 = vmatpush1.bf16.msra.mxu0 %v2211_v15  ;;  %1954 = vmatprep.subr.bf16.mxu1 %v2609_v0  ;;  %p2554_p12 = scmp.ne.s32.totalorder %s1801_s0, %s2553_s21  ;;  %p2559_p0 = scmp.lt.s32.totalorder %s2553_s21, %s2553_s21 }
  0xee   :  { %407 = vmatprep.subr.bf16.mxu0 %v2213_v17 }
  0xef   :  { %p2560_p1 = por %p2559_p0, %p2558_p13 }
  0xf0   :  { %1955 = vmatpush3.bf16.msra.mxu1 %v2216_v19 }
  0xf1   :  { %408 = vmatpush1.bf16.msra.mxu0 %v2215_v18  ;;  %1956 = vmatprep.subr.bf16.mxu1 %v2609_v0  ;;  %p2561_p2 = pnand %p2560_p1, %p2554_p12 }
  0xf2   :  { %409 = vmatprep.subr.bf16.mxu0 %v2217_v20 }
  0xf4   :  { %1957 = vmatpush3.bf16.msra.mxu1 %v2220_v22 }
  0xf5   :  { %410 = vmatpush1.bf16.msra.mxu0 %v2219_v21  ;;  %1958 = vmatprep.subr.bf16.mxu1 %v2609_v0 }
  0xf6   :  { %411 = vmatprep.subr.bf16.mxu0 %v2221_v23 }
  0xf8   :  { %1959 = vmatpush3.bf16.msra.mxu1 %v2224_v26 }
  0xf9   :  { %412 = vmatpush1.bf16.msra.mxu0 %v2223_v25  ;;  %1960 = vmatprep.subr.bf16.mxu1 %v2609_v0 }
  0xfa   :  { %413 = vmatprep.subr.bf16.mxu0 %v2225_v27 }
  0xfc   :  { %1961 = vmatpush3.bf16.msra.mxu1 %v2228_v29 }
  0xfd   :  { %414 = vmatpush1.bf16.msra.mxu0 %v2227_v28  ;;  %1972 = vmatprep.subr.bf16.mxu1 %v2609_v0 }
  0xfe   :  { %1966 = vmatprep.subr.bf16.mxu0 %v2609_v0 }
 0x16c   :  { %v197_v30 = vpop.xlane.xlu0 %196 }
 0x16d   :  { %v206_v31 = vmul.f32 0.03125, %v197_v30 }
 0x16e   :  { %v203_v32 = vpop.xlane.xlu1 %202 }
 0x16f   :  { %v210_v33 = vmul.f32 %v206_v31, %v206_v31  ;;  %v208_v34 = vmul.f32 0.03125, %v203_v32  ;;  %v218_v44 = vsub.f32 %v2868_v1, %v206_v31 }
 0x170   :  { %v199_v35 = vpop.xlane.xlu0 %198 }
 0x171   :  { %v212_v36 = vsub.f32 %v208_v34, %v210_v33  ;;  %v207_v37 = vmul.f32 0.03125, %v199_v35 }
 0x172   :  { %v205_v38 = vpop.xlane.xlu1 %204 }
 0x173   :  { %v214_v39 = vadd.f32 1e-05, %v212_v36  ;;  %v211_v40 = vmul.f32 %v207_v37, %v207_v37  ;;  %v209_v41 = vmul.f32 0.03125, %v205_v38  ;;  %v219_v48 = vsub.f32 %v2870_v2, %v207_v37 }
 0x175   :  { %2247 = vrsqrt.f32 %v214_v39  ;;  %v213_v42 = vsub.f32 %v209_v41, %v211_v40 }
 0x177   :  { %v215_v43 = vadd.f32 1e-05, %v213_v42 }
 0x179   :  { %2249 = vrsqrt.f32 %v215_v43 }
 0x17f   :  { %v2248_v45 = vpop.eup %2247 }
 0x180   :  { %v220_v46 = vmul.f32 %v2248_v45, %v218_v44 }
 0x182   :  { %v228_v51 = vmul.f32 %v1818_v47, %v220_v46 }
 0x183   :  { %v2250_v49 = vpop.eup %2249 }
 0x184   :  { %v221_v50 = vmul.f32 %v2250_v49, %v219_v48  ;;  %v236_v54 = vadd.f32 %v1819_v52, %v228_v51  ;;  %v936_v51 = vlaneseq }
 0x186   :  { %v229_v53 = vmul.f32 %v1818_v47, %v221_v50 }
 0x188   :  { %v237_v55 = vadd.f32 %v1819_v52, %v229_v53  ;;  %v937_v52 = vshrl.u32 %v936_v51, 7  ;;  %v939_v53 = vand.u32 127, %v936_v51 }
 0x18a   :  { %v238_v56 = vpack.c.bf16 %v237_v55, %v236_v54  ;;  %vm2957_vm3 = vcmp.ge.s32.totalorder %v937_v52, %v939_v53 }
 0x18c   :  { %432 = vmatmul.mubr.bf16.vlgmr.msra.gmra.mrb[0].mxu0 %v238_v56  ;;  %1963 = vmatmul.mubr.bf16.vlgmr.msra.gmra.mrb[0].mxu1 %v238_v56 }
 0x18d   :  { %1968 = vmatprep.mubr.msk.bf16.mxu0 %vm2611_vm0, %v2609_v0  ;;  %1974 = vmatprep.mubr.msk.bf16.mxu1 %vm2611_vm0, %v2609_v0 }
 0x25f   :  { %v433_v57 = vpop.f32.mrb[0].mxu0  ;;  %v2895_v58 = vpop.f32.mrb[0].mxu1 }
 0x260   :  { %v435_v59 = vpop.f32.mrb[1].mxu0  ;;  %v1964_v60 = vpop.f32.mrb[1].mxu1  ;;  %v503_v9 = vpack.c.bf16 %v433_v57, %v433_v57  ;;  %v559_v45 = vpack.c.bf16 %v2895_v58, %v2895_v58 }
 0x261   :  { %v437_v61 = vpop.f32.mrb[2].mxu0  ;;  %v2897_v62 = vpop.f32.mrb[2].mxu1  ;;  %v531_v63 = vpack.c.bf16 %v435_v59, %v435_v59 }
 0x262   :  { %v439_v1 = vpop.f32.mrb[3].mxu0  ;;  %v1965_v2 = vpop.f32.mrb[3].mxu1  ;;  %v2142_v3 = vpack.i.bf16 %v437_v61, %v433_v57  ;;  %v2903_v7 = vpack.i.bf16 %v2897_v62, %v2895_v58  ;;  %v504_v10 = vpack.c.bf16 %v437_v61, %v437_v61  ;;  %v560_v46 = vpack.c.bf16 %v2897_v62, %v2897_v62 }
 0x263   :  { %v572_v4 = vsel %vm567_vm1, %v531_v63, 0  ;;  %v2137_v5 = vpack.i.bf16 %v439_v1, %v435_v59  ;;  %v532_v6 = vpack.c.bf16 %v439_v1, %v439_v1  ;;  %v1052_v49 = vsel %vm1050_vm2, %v559_v45, 0 }
 0x264   :  { %1967 = vmatpush3.bf16.xpose.msra.mxu0 %v572_v4  ;;  %2143 = vrot.lane.b32.xlu1 %v2142_v3, %s2612_s11  ;;  %v1098_v50 = vsel %vm1050_vm2, %v560_v46, 0 }
 0x265   :  { %2138 = vrot.lane.b32.xlu0 %v2137_v5, %s2612_s11  ;;  %v618_v8 = vsel %vm567_vm1, %v532_v6, 0  ;;  %1978 = vmatprep.subr.bf16.mxu0 %v2609_v0 }
 0x266   :  { %1973 = vmatpush3.bf16.xpose.msra.mxu1 %v618_v8 }
 0x267   :  { %1984 = vmatprep.subr.bf16.mxu1 %v2609_v0 }
 0x268   :  { %2148 = vrot.lane.b32.xlu1 %v2137_v5, %s2613_s24 }
 0x269   :  { %2158 = vrot.lane.b32.xlu0 %v2137_v5, %s2614_s7 }
 0x26b   :  { %1969 = vmatmul.mubr.msk.bf16.vlgmr.msra.gmra.mrb[4].mxu0 %vm567_vm1, %v503_v9 }
 0x26c   :  { %2153 = vrot.lane.b32.xlu1 %v2142_v3, %s2613_s24  ;;  %1980 = vmatprep.mubr.msk.bf16.mxu0 %vm2611_vm0, %v2609_v0 }
 0x26d   :  { %1975 = vmatmul.mubr.msk.bf16.vlgmr.msra.gmra.mrb[4].mxu1 %vm567_vm1, %v504_v10 }
 0x26e   :  { %1986 = vmatprep.mubr.msk.bf16.mxu1 %vm2611_vm0, %v2609_v0 }
 0x270   :  { %2163 = vrot.lane.b32.xlu1 %v2142_v3, %s2614_s7 }
 0x2d6   :  { %v2144_v11 = vpop.permute.xlu1 %2143 }
 0x2d7   :  { %v2139_v12 = vpop.permute.xlu0 %2138  ;;  %v2146_v22 = vunpack.i.h.bf16 %v2144_v11  ;;  %v2145_v23 = vunpack.i.l.bf16 %v2144_v11 }
 0x2d8   :  { %v2141_v13 = vunpack.i.h.bf16 %v2139_v12  ;;  %v2140_v14 = vunpack.i.l.bf16 %v2139_v12 }
 0x2d9   :  { %v506_v27 = vpack.c.bf16 %v2146_v22, %v2146_v22  ;;  %v505_v28 = vpack.c.bf16 %v2145_v23, %v2145_v23 }
 0x2da   :  { %v534_v15 = vpack.c.bf16 %v2141_v13, %v2141_v13  ;;  %v533_v16 = vpack.c.bf16 %v2140_v14, %v2140_v14  ;;  %v2149_v17 = vpop.permute.xlu1 %2148 }
 0x2db   :  { %v2151_v18 = vunpack.i.h.bf16 %v2149_v17  ;;  %v2150_v19 = vunpack.i.l.bf16 %v2149_v17  ;;  %v2159_v26 = vpop.permute.xlu0 %2158 }
 0x2dc   :  { %v664_v20 = vsel %vm567_vm1, %v533_v16, 0  ;;  %v710_v21 = vsel %vm567_vm1, %v534_v15, 0  ;;  %v2161_v30 = vunpack.i.h.bf16 %v2159_v26  ;;  %v2160_v31 = vunpack.i.l.bf16 %v2159_v26 }
 0x2dd   :  { %1979 = vmatpush3.bf16.xpose.msra.mxu0 %v664_v20  ;;  %1985 = vmatpush3.bf16.xpose.msra.mxu1 %v710_v21  ;;  %v536_v24 = vpack.c.bf16 %v2151_v18, %v2151_v18  ;;  %v535_v25 = vpack.c.bf16 %v2150_v19, %v2150_v19 }
 0x2de   :  { %1990 = vmatprep.subr.bf16.mxu0 %v2609_v0  ;;  %1996 = vmatprep.subr.bf16.mxu1 %v2609_v0  ;;  %v2154_v29 = vpop.permute.xlu1 %2153  ;;  %v538_v36 = vpack.c.bf16 %v2161_v30, %v2161_v30  ;;  %v537_v37 = vpack.c.bf16 %v2160_v31, %v2160_v31 }
 0x2df   :  { %v756_v32 = vsel %vm567_vm1, %v535_v25, 0  ;;  %v802_v33 = vsel %vm567_vm1, %v536_v24, 0  ;;  %v2156_v34 = vunpack.i.h.bf16 %v2154_v29  ;;  %v2155_v35 = vunpack.i.l.bf16 %v2154_v29 }
 0x2e0   :  { %v848_v41 = vsel %vm567_vm1, %v537_v37, 0  ;;  %v894_v42 = vsel %vm567_vm1, %v538_v36, 0 }
 0x2e1   :  { %v508_v38 = vpack.c.bf16 %v2156_v34, %v2156_v34  ;;  %v507_v39 = vpack.c.bf16 %v2155_v35, %v2155_v35 }
 0x2e2   :  { %v2164_v40 = vpop.permute.xlu1 %2163 }
 0x2e3   :  { %v2166_v43 = vunpack.i.h.bf16 %v2164_v40  ;;  %v2165_v44 = vunpack.i.l.bf16 %v2164_v40 }
 0x2e4   :  { %1981 = vmatmul.mubr.msk.bf16.vlgmr.msra.gmra.mrb[8].mxu0 %vm567_vm1, %v505_v28  ;;  %1987 = vmatmul.mubr.msk.bf16.vlgmr.msra.gmra.mrb[8].mxu1 %vm567_vm1, %v506_v27 }
 0x2e5   :  { %1991 = vmatpush3.bf16.xpose.msra.mxu0 %v756_v32  ;;  %1997 = vmatpush3.bf16.xpose.msra.mxu1 %v802_v33  ;;  %v510_v47 = vpack.c.bf16 %v2166_v43, %v2166_v43  ;;  %v509_v48 = vpack.c.bf16 %v2165_v44, %v2165_v44 }
 0x2e6   :  { %1992 = vmatprep.mubr.msk.bf16.mxu0 %vm2611_vm0, %v2609_v0  ;;  %1998 = vmatprep.mubr.msk.bf16.mxu1 %vm2611_vm0, %v2609_v0 }
 0x2e7   :  { %2002 = vmatprep.subr.bf16.mxu0 %v2609_v0  ;;  %2008 = vmatprep.subr.bf16.mxu1 %v2609_v0 }
 0x2ec   :  { %1993 = vmatmul.mubr.msk.bf16.vlgmr.msra.gmra.mrb[12].mxu0 %vm567_vm1, %v507_v39  ;;  %1999 = vmatmul.mubr.msk.bf16.vlgmr.msra.gmra.mrb[12].mxu1 %vm567_vm1, %v508_v38 }
 0x2ed   :  { %2003 = vmatpush3.bf16.xpose.msra.mxu0 %v848_v41  ;;  %2009 = vmatpush3.bf16.xpose.msra.mxu1 %v894_v42 }
 0x2ee   :  { %2004 = vmatprep.mubr.msk.bf16.mxu0 %vm2611_vm0, %v2609_v0  ;;  %2010 = vmatprep.mubr.msk.bf16.mxu1 %vm2611_vm0, %v2609_v0 }
 0x2ef   :  { %2014 = vmatprep.subr.bf16.mxu0 %v2609_v0  ;;  %2020 = vmatprep.subr.bf16.mxu1 %v2609_v0 }
 0x2f4   :  { %2005 = vmatmul.mubr.msk.bf16.vlgmr.msra.gmra.mrb[16].mxu0 %vm567_vm1, %v509_v48  ;;  %2011 = vmatmul.mubr.msk.bf16.vlgmr.msra.gmra.mrb[16].mxu1 %vm567_vm1, %v510_v47 }
 0x2f5   :  { %2015 = vmatpush3.bf16.msra.mxu0 %v1052_v49  ;;  %2021 = vmatpush3.bf16.msra.mxu1 %v1098_v50 }
 0x2f6   :  { %2016 = vmatprep.mubr.msk.bf16.mxu0 %vm2611_vm0, %v2609_v0  ;;  %2022 = vmatprep.mubr.msk.bf16.mxu1 %vm2611_vm0, %v2609_v0 }
 0x2f7   :  { %2026 = vmatprep.subr.bf16.mxu0 %v2609_v0  ;;  %2032 = vmatprep.subr.bf16.mxu1 %v2609_v0 }
 0x33e   :  { %v608_v55 = vpop.f32.mrb[4].mxu0 }
 0x33f   :  { %v943_v56 = vsel %vm2957_vm3, %v608_v55, -1e+30  ;;  %v1970_v57 = vpop.f32.mrb[5].mxu0 }
 0x340   :  { %v611_v58 = vpop.f32.mrb[6].mxu0  ;;  %v654_v59 = vpop.f32.mrb[4].mxu1  ;;  %v951_v60 = vsel %vm567_vm1, %v943_v56, -inf }
 0x341   :  { %v944_v61 = vsel %vm2957_vm3, %v654_v59, -1e+30  ;;  %952 = vmax.xlane.f32.xlu0 %v951_v60  ;;  %v1971_v62 = vpop.f32.mrb[7].mxu0  ;;  %v1976_v63 = vpop.f32.mrb[5].mxu1 }
 0x342   :  { %v657_v1 = vpop.f32.mrb[6].mxu1  ;;  %v954_v2 = vsel %vm567_vm1, %v944_v61, -inf }
 0x343   :  { %955 = vmax.xlane.f32.xlu1 %v954_v2  ;;  %v1977_v3 = vpop.f32.mrb[7].mxu1 }
 0x3b7   :  { %v700_v4 = vpop.f32.mrb[8].mxu0  ;;  %v746_v5 = vpop.f32.mrb[8].mxu1 }
 0x3b8   :  { %v945_v6 = vsel %vm2957_vm3, %v700_v4, -1e+30  ;;  %v1982_v8 = vpop.f32.mrb[9].mxu0  ;;  %v1988_v9 = vpop.f32.mrb[9].mxu1  ;;  %v946_v13 = vsel %vm2957_vm3, %v746_v5, -1e+30 }
 0x3b9   :  { %v703_v10 = vpop.f32.mrb[10].mxu0  ;;  %v749_v11 = vpop.f32.mrb[10].mxu1  ;;  %v957_v12 = vsel %vm567_vm1, %v945_v6, -inf  ;;  %v960_v16 = vsel %vm567_vm1, %v946_v13, -inf }
 0x3ba   :  { %958 = vmax.xlane.f32.xlu0 %v957_v12  ;;  %v1983_v14 = vpop.f32.mrb[11].mxu0  ;;  %v1989_v15 = vpop.f32.mrb[11].mxu1 }
 0x3be   :  { %961 = vmax.xlane.f32.xlu0 %v960_v16 }
 0x3bf   :  { %v792_v17 = vpop.f32.mrb[12].mxu0  ;;  %v838_v18 = vpop.f32.mrb[12].mxu1 }
 0x3c0   :  { %v947_v19 = vsel %vm2957_vm3, %v792_v17, -1e+30  ;;  %v948_v20 = vsel %vm2957_vm3, %v838_v18, -1e+30  ;;  %v1994_v21 = vpop.f32.mrb[13].mxu0  ;;  %v2000_v22 = vpop.f32.mrb[13].mxu1 }
 0x3c1   :  { %v795_v23 = vpop.f32.mrb[14].mxu0  ;;  %v841_v24 = vpop.f32.mrb[14].mxu1  ;;  %v963_v25 = vsel %vm567_vm1, %v947_v19, -inf  ;;  %v966_v26 = vsel %vm567_vm1, %v948_v20, -inf }
 0x3c2   :  { %v1995_v27 = vpop.f32.mrb[15].mxu0  ;;  %964 = vmax.xlane.f32.xlu0 %v963_v25  ;;  %967 = vmax.xlane.f32.xlu1 %v966_v26  ;;  %v2001_v28 = vpop.f32.mrb[15].mxu1 }
 0x3c7   :  { %v884_v29 = vpop.f32.mrb[16].mxu0  ;;  %v930_v30 = vpop.f32.mrb[16].mxu1 }
 0x3c8   :  { %v949_v31 = vsel %vm2957_vm3, %v884_v29, -1e+30  ;;  %v2983_v32 = vsel %vm2957_vm3, %v930_v30, -1e+30  ;;  %v2006_v33 = vpop.f32.mrb[17].mxu0  ;;  %v2012_v34 = vpop.f32.mrb[17].mxu1 }
 0x3c9   :  { %v887_v35 = vpop.f32.mrb[18].mxu0  ;;  %v933_v36 = vpop.f32.mrb[18].mxu1  ;;  %v969_v37 = vsel %vm567_vm1, %v949_v31, -inf  ;;  %v972_v38 = vsel %vm567_vm1, %v2983_v32, -inf }
 0x3ca   :  { %v2007_v39 = vpop.f32.mrb[19].mxu0  ;;  %970 = vmax.xlane.f32.xlu0 %v969_v37  ;;  %973 = vmax.xlane.f32.xlu1 %v972_v38  ;;  %v2013_v40 = vpop.f32.mrb[19].mxu1 }
 0x3ce   :  { %v953_v41 = vpop.xlane.xlu0 %952 }
 0x3cf   :  { %v975_v42 = vsub.f32 %v943_v56, %v953_v41 }
 0x3d0   :  { %v956_v43 = vpop.xlane.xlu1 %955 }
 0x3d1   :  { %v983_v44 = vmul.f32 1.442695, %v975_v42  ;;  %v976_v45 = vsub.f32 %v944_v61, %v956_v43 }
 0x3d3   :  { %2251 = vpow2.f32 %v983_v44  ;;  %v985_v46 = vmul.f32 1.442695, %v976_v45 }
 0x3d5   :  { %2253 = vpow2.f32 %v985_v46 }
 0x3dd   :  { %v2252_v47 = vpop.eup %2251 }
 0x3de   :  { %v999_v48 = vsel %vm567_vm1, %v2252_v47, 0.0 }
 0x3df   :  { %v2254_v49 = vpop.eup %2253  ;;  %1000 = vadd.xlane.f32.xlu0 %v999_v48 }
 0x3e0   :  { %v1002_v50 = vsel %vm567_vm1, %v2254_v49, 0.0 }
 0x3e1   :  { %1003 = vadd.xlane.f32.xlu1 %v1002_v50 }
 0x447   :  { %v959_v51 = vpop.xlane.xlu0 %958 }
 0x448   :  { %v977_v52 = vsub.f32 %v945_v6, %v959_v51 }
 0x44a   :  { %v987_v53 = vmul.f32 1.442695, %v977_v52 }
 0x44b   :  { %v962_v54 = vpop.xlane.xlu0 %961 }
 0x44c   :  { %2255 = vpow2.f32 %v987_v53  ;;  %v978_v55 = vsub.f32 %v946_v13, %v962_v54 }
 0x44e   :  { %v989_v56 = vmul.f32 1.442695, %v978_v55 }
 0x44f   :  { %v965_v57 = vpop.xlane.xlu0 %964  ;;  %v968_v58 = vpop.xlane.xlu1 %967 }
 0x450   :  { %2257 = vpow2.f32 %v989_v56  ;;  %v979_v59 = vsub.f32 %v947_v19, %v965_v57  ;;  %v980_v60 = vsub.f32 %v948_v20, %v968_v58 }
 0x452   :  { %v991_v61 = vmul.f32 1.442695, %v979_v59  ;;  %v993_v62 = vmul.f32 1.442695, %v980_v60 }
 0x454   :  { %2259 = vpow2.f32 %v991_v61 }
 0x455   :  { %2261 = vpow2.f32 %v993_v62 }
 0x456   :  { %v2256_v63 = vpop.eup %2255 }
 0x457   :  { %v971_v1 = vpop.xlane.xlu0 %970  ;;  %v1005_v2 = vsel %vm567_vm1, %v2256_v63, 0.0  ;;  %v974_v14 = vpop.xlane.xlu1 %973 }
 0x458   :  { %v981_v3 = vsub.f32 %v949_v31, %v971_v1  ;;  %1006 = vadd.xlane.f32.xlu0 %v1005_v2  ;;  %v982_v23 = vsub.f32 %v2983_v32, %v974_v14 }
 0x45a   :  { %v2258_v4 = vpop.eup %2257  ;;  %v995_v5 = vmul.f32 1.442695, %v981_v3  ;;  %v997_v24 = vmul.f32 1.442695, %v982_v23 }
 0x45b   :  { %v1008_v6 = vsel %vm567_vm1, %v2258_v4, 0.0 }
 0x45c   :  { %2263 = vpow2.f32 %v995_v5  ;;  %1009 = vadd.xlane.f32.xlu1 %v1008_v6 }
 0x45e   :  { %v2992_v8 = vpop.eup %2259 }
 0x45f   :  { %v2994_v9 = vpop.eup %2261  ;;  %v1011_v10 = vsel %vm567_vm1, %v2992_v8, 0.0 }
 0x460   :  { %1012 = vadd.xlane.f32.xlu0 %v1011_v10  ;;  %v1014_v11 = vsel %vm567_vm1, %v2994_v9, 0.0 }
 0x461   :  { %1015 = vadd.xlane.f32.xlu1 %v1014_v11 }
 0x466   :  { %v3000_v12 = vpop.eup %2263 }
 0x467   :  { %v1017_v13 = vsel %vm567_vm1, %v3000_v12, 0.0 }
 0x468   :  { %1018 = vadd.xlane.f32.xlu0 %v1017_v13 }
 0x46c   :  { %v1001_v15 = vpop.xlane.xlu0 %1000 }
 0x46d   :  { %2265 = vrcp.f32 %v1001_v15 }
 0x46e   :  { %v1004_v16 = vpop.xlane.xlu1 %1003 }
 0x46f   :  { %2267 = vrcp.f32 %v1004_v16 }
 0x470   :  { %2269 = vpow2.f32 %v997_v24 }
 0x472   :  { %2173 = vrot.lane.b32.xlu1 %v2903_v7, %s2613_s24 }
 0x477   :  { %v2266_v17 = vpop.eup %2265 }
 0x478   :  { %v1031_v18 = vmul.f32 %v2266_v17, %v2252_v47 }
 0x479   :  { %v2268_v19 = vpop.eup %2267 }
 0x47a   :  { %v1032_v20 = vmul.f32 %v2268_v19, %v2254_v49  ;;  %v1039_v21 = vpack.c.bf16 %v1031_v18, %v1031_v18  ;;  %v3015_v25 = vpop.eup %2269  ;;  %v2229_v19 = vld [vmem:[#allocation10] sm:$0xff]  }
 0x47b   :  { %v1020_v26 = vsel %vm567_vm1, %v3015_v25, 0.0 }
 0x47c   :  { %2017 = vmatmul.mubr.msk.bf16.vlgmr.msra.gmra.mrb[20].mxu0 %vm567_vm1, %v1039_v21  ;;  %v1040_v22 = vpack.c.bf16 %v1032_v20, %v1032_v20 }
 0x47d   :  { %2028 = vmatprep.mubr.msk.bf16.mxu0 %vm2611_vm0, %v2609_v0 }
 0x47e   :  { %2168 = vrot.lane.b32.xlu0 %v2903_v7, %s2612_s11  ;;  %2023 = vmatmul.mubr.msk.bf16.vlgmr.msra.gmra.mrb[20].mxu1 %vm567_vm1, %v1040_v22 }
 0x47f   :  { %2034 = vmatprep.mubr.msk.bf16.mxu1 %vm2611_vm0, %v2609_v0 }
 0x496   :  { %1021 = vadd.xlane.f32.xlu1 %v1020_v26 }
 0x4a7   :  { %2178 = vrot.lane.b32.xlu1 %v2903_v7, %s2614_s7 }
 0x4e5   :  { %v1007_v27 = vpop.xlane.xlu0 %1006 }
 0x4e6   :  { %2271 = vrcp.f32 %v1007_v27 }
 0x4e9   :  { %v1010_v28 = vpop.xlane.xlu1 %1009 }
 0x4ea   :  { %2273 = vrcp.f32 %v1010_v28 }
 0x4ed   :  { %v1013_v29 = vpop.xlane.xlu0 %1012 }
 0x4ee   :  { %v1016_v30 = vpop.xlane.xlu1 %1015  ;;  %2275 = vrcp.f32 %v1013_v29 }
 0x4ef   :  { %2277 = vrcp.f32 %v1016_v30 }
 0x4f0   :  { %v2272_v33 = vpop.eup %2271 }
 0x4f1   :  { %v1033_v40 = vmul.f32 %v2272_v33, %v2256_v63 }
 0x4f2   :  { %v2174_v32 = vpop.permute.xlu1 %2173 }
 0x4f3   :  { %v2176_v36 = vunpack.i.h.bf16 %v2174_v32  ;;  %v2175_v37 = vunpack.i.l.bf16 %v2174_v32  ;;  %v1041_v48 = vpack.c.bf16 %v1033_v40, %v1033_v40 }
 0x4f4   :  { %v2274_v34 = vpop.eup %2273 }
 0x4f5   :  { %v1019_v31 = vpop.xlane.xlu0 %1018  ;;  %v1034_v41 = vmul.f32 %v2274_v34, %v2258_v4  ;;  %v564_v43 = vpack.c.bf16 %v2176_v36, %v2176_v36  ;;  %v563_v44 = vpack.c.bf16 %v2175_v37, %v2175_v37  ;;  %v2230_v36 = vld [vmem:[#allocation10 + $0x8] sm:$0xff]  }
 0x4f6   :  { %2279 = vrcp.f32 %v1019_v31 }
 0x4f7   :  { %v1042_v49 = vpack.c.bf16 %v1034_v41, %v1034_v41  ;;  %v1236_v51 = vsel %vm1050_vm2, %v563_v44, 0  ;;  %v1282_v52 = vsel %vm1050_vm2, %v564_v43, 0 }
 0x4f8   :  { %v2276_v47 = vpop.eup %2275 }
 0x4f9   :  { %v2169_v35 = vpop.permute.xlu0 %2168  ;;  %v2278_v50 = vpop.eup %2277  ;;  %v1035_v53 = vmul.f32 %v2276_v47, %v2992_v8 }
 0x4fa   :  { %v2171_v38 = vunpack.i.h.bf16 %v2169_v35  ;;  %v2170_v39 = vunpack.i.l.bf16 %v2169_v35  ;;  %v1036_v54 = vmul.f32 %v2278_v50, %v2994_v9 }
 0x4fb   :  { %v1043_v55 = vpack.c.bf16 %v1035_v53, %v1035_v53 }
 0x4fc   :  { %v562_v7 = vpack.c.bf16 %v2171_v38, %v2171_v38  ;;  %v561_v42 = vpack.c.bf16 %v2170_v39, %v2170_v39  ;;  %v1044_v56 = vpack.c.bf16 %v1036_v54, %v1036_v54 }
 0x4fe   :  { %v1144_v45 = vsel %vm1050_vm2, %v561_v42, 0  ;;  %v1190_v46 = vsel %vm1050_vm2, %v562_v7, 0 }
 0x4ff   :  { %2027 = vmatpush3.bf16.msra.mxu0 %v1144_v45  ;;  %2033 = vmatpush3.bf16.msra.mxu1 %v1190_v46 }
 0x500   :  { %2038 = vmatprep.subr.bf16.mxu0 %v2609_v0  ;;  %2044 = vmatprep.subr.bf16.mxu1 %v2609_v0  ;;  %v2280_v58 = vpop.eup %2279 }
 0x501   :  { %v1037_v62 = vmul.f32 %v2280_v58, %v3000_v12 }
 0x502   :  { %2029 = vmatmul.mubr.msk.bf16.vlgmr.msra.gmra.mrb[24].mxu0 %vm567_vm1, %v1041_v48  ;;  %2035 = vmatmul.mubr.msk.bf16.vlgmr.msra.gmra.mrb[24].mxu1 %vm567_vm1, %v1042_v49 }
 0x503   :  { %2039 = vmatpush3.bf16.msra.mxu0 %v1236_v51  ;;  %2045 = vmatpush3.bf16.msra.mxu1 %v1282_v52  ;;  %v1045_v5 = vpack.c.bf16 %v1037_v62, %v1037_v62 }
 0x504   :  { %2040 = vmatprep.mubr.msk.bf16.mxu0 %vm2611_vm0, %v2609_v0  ;;  %2046 = vmatprep.mubr.msk.bf16.mxu1 %vm2611_vm0, %v2609_v0 }
 0x505   :  { %2050 = vmatprep.subr.bf16.mxu0 %v2609_v0  ;;  %2056 = vmatprep.subr.bf16.mxu1 %v2609_v0 }
 0x50a   :  { %2041 = vmatmul.mubr.msk.bf16.vlgmr.msra.gmra.mrb[28].mxu0 %vm567_vm1, %v1043_v55  ;;  %2047 = vmatmul.mubr.msk.bf16.vlgmr.msra.gmra.mrb[28].mxu1 %vm567_vm1, %v1044_v56 }
 0x50b   :  { %2052 = vmatprep.mubr.msk.bf16.mxu0 %vm2611_vm0, %v2609_v0  ;;  %2058 = vmatprep.mubr.msk.bf16.mxu1 %vm2611_vm0, %v2609_v0 }
 0x523   :  { %v1022_v57 = vpop.xlane.xlu1 %1021 }
 0x524   :  { %2281 = vrcp.f32 %v1022_v57 }
 0x527   :  { %v2179_v59 = vpop.permute.xlu1 %2178 }
 0x528   :  { %v2181_v60 = vunpack.i.h.bf16 %v2179_v59  ;;  %v2180_v61 = vunpack.i.l.bf16 %v2179_v59 }
 0x52a   :  { %v566_v63 = vpack.c.bf16 %v2181_v60, %v2181_v60  ;;  %v565_v1 = vpack.c.bf16 %v2180_v61, %v2180_v61  ;;  %v1860_v61 = vld [vmem:[#allocation11] ss:$0 sm:$0xff] }
 0x52c   :  { %v1328_v2 = vsel %vm1050_vm2, %v565_v1, 0  ;;  %v1374_v3 = vsel %vm1050_vm2, %v566_v63, 0 }
 0x52d   :  { %2051 = vmatpush3.bf16.msra.mxu0 %v1328_v2  ;;  %2057 = vmatpush3.bf16.msra.mxu1 %v1374_v3  ;;  %v2287_v3 = vld [vmem:[#allocation2] sm:$0xff] }
 0x52e   :  { %v2282_v4 = vpop.eup %2281  ;;  %2062 = vmatprep.subr.bf16.mxu0 %v2609_v0  ;;  %2070 = vmatprep.subr.bf16.mxu1 %v2609_v0 }
 0x52f   :  { %v1038_v6 = vmul.f32 %v2282_v4, %v3015_v25 }
 0x530   :  { %2053 = vmatmul.mubr.msk.bf16.vlgmr.msra.gmra.mrb[32].mxu0 %vm567_vm1, %v1045_v5 }
 0x531   :  { %v1046_v8 = vpack.c.bf16 %v1038_v6, %v1038_v6  ;;  %2066 = vmatprep.mubr.msk.bf16.mxu0 %vm2611_vm0, %v2609_v0  ;;  %2063 = vmatpush3.bf16.msra.mxu0 %v2229_v19  ;;  %v2238_v19 = vld [vmem:[#allocation16 + $0x38] sm:$0xff]  }
 0x532   :  { %2064 = vmatprep.subr.bf16.mxu0 %v2609_v0 }
 0x533   :  { %2059 = vmatmul.mubr.msk.bf16.vlgmr.msra.gmra.mrb[32].mxu1 %vm567_vm1, %v1046_v8  ;;  %v2288_v8 = vld [vmem:[#allocation2 + $0x8] sm:$0xff] }
 0x534   :  { %2086 = vmatprep.mubr.msk.bf16.mxu1 %vm2611_vm0, %v2609_v0 }
 0x535   :  { %2065 = vmatpush3.bf16.msra.mxu0 %v2230_v36 }
 0x536   :  { %2090 = vmatprep.subr.bf16.mxu0 %v2609_v0 }
 0x54f   :  { %v1088_v9 = vpop.f32.mrb[20].mxu0 }
 0x550   :  { %v2018_v10 = vpop.f32.mrb[21].mxu0 }
 0x551   :  { %v1091_v11 = vpop.f32.mrb[22].mxu0  ;;  %v1134_v12 = vpop.f32.mrb[20].mxu1 }
 0x552   :  { %v2019_v13 = vpop.f32.mrb[23].mxu0  ;;  %v2024_v14 = vpop.f32.mrb[21].mxu1 }
 0x553   :  { %v1137_v15 = vpop.f32.mrb[22].mxu1  ;;  %v2232_v13 = vld [vmem:[#allocation16 + $0x8] sm:$0xff]   ;;  %v2233_v14 = vld [vmem:[#allocation16 + $0x10] sm:$0xff]  }
 0x554   :  { %v2025_v16 = vpop.f32.mrb[23].mxu1  ;;  %v2234_v15 = vld [vmem:[#allocation16 + $0x18] sm:$0xff]  }
 0x555   :  { %v2235_v16 = vld [vmem:[#allocation16 + $0x20] sm:$0xff]  }
 0x5d5   :  { %v1180_v17 = vpop.f32.mrb[24].mxu0  ;;  %v1226_v18 = vpop.f32.mrb[24].mxu1 }
 0x5d6   :  { %v2182_v20 = vpack.i.bf16 %v1226_v18, %v1180_v17  ;;  %v2030_v21 = vpop.f32.mrb[25].mxu0  ;;  %v2036_v22 = vpop.f32.mrb[25].mxu1  ;;  %v2236_v17 = vld [vmem:[#allocation16 + $0x28] sm:$0xff]   ;;  %v2237_v18 = vld [vmem:[#allocation16 + $0x30] sm:$0xff]  }
 0x5d7   :  { %v1183_v23 = vpop.f32.mrb[26].mxu0  ;;  %v1229_v24 = vpop.f32.mrb[26].mxu1  ;;  %v2240_v21 = vld [vmem:[#allocation19 + $0x8] sm:$0xff]   ;;  %v2241_v22 = vld [vmem:[#allocation19 + $0x10] sm:$0xff]  }
 0x5d8   :  { %v2031_v25 = vpop.f32.mrb[27].mxu0  ;;  %2183 = vrot.lane.b32.xlu1 %v2182_v20, %s2600_s19  ;;  %v2037_v26 = vpop.f32.mrb[27].mxu1  ;;  %v2239_v20 = vld [vmem:[#allocation19] sm:$0xff]   ;;  %v2242_v23 = vld [vmem:[#allocation19 + $0x18] sm:$0xff]  }
 0x5d9   :  { %v2243_v24 = vld [vmem:[#allocation19 + $0x20] sm:$0xff]   ;;  %v2244_v25 = vld [vmem:[#allocation19 + $0x28] sm:$0xff]  }
 0x5dd   :  { %v1272_v27 = vpop.f32.mrb[28].mxu0  ;;  %v1318_v28 = vpop.f32.mrb[28].mxu1 }
 0x5de   :  { %v2187_v29 = vpack.i.bf16 %v1318_v28, %v1272_v27  ;;  %v2042_v30 = vpop.f32.mrb[29].mxu0  ;;  %v2048_v31 = vpop.f32.mrb[29].mxu1 }
 0x5df   :  { %v1275_v32 = vpop.f32.mrb[30].mxu0  ;;  %v1321_v33 = vpop.f32.mrb[30].mxu1 }
 0x5e0   :  { %v2043_v34 = vpop.f32.mrb[31].mxu0  ;;  %2188 = vrot.lane.b32.xlu0 %v2187_v29, %s2615_s15  ;;  %v2049_v35 = vpop.f32.mrb[31].mxu1 }
 0x603   :  { %v1364_v37 = vpop.f32.mrb[32].mxu0 }
 0x604   :  { %v2054_v38 = vpop.f32.mrb[33].mxu0 }
 0x605   :  { %v1367_v39 = vpop.f32.mrb[34].mxu0 }
 0x606   :  { %v2055_v40 = vpop.f32.mrb[35].mxu0  ;;  %v1410_v41 = vpop.f32.mrb[32].mxu1 }
 0x607   :  { %v2192_v7 = vpack.i.bf16 %v1410_v41, %v1364_v37  ;;  %v2060_v42 = vpop.f32.mrb[33].mxu1 }
 0x608   :  { %v1413_v43 = vpop.f32.mrb[34].mxu1  ;;  %v1864_v42 = vld [vmem:[#allocation13] ss:$0 sm:$0xff] }
 0x609   :  { %2193 = vrot.lane.b32.xlu1 %v2192_v7, %s2616_s28  ;;  %v2061_v44 = vpop.f32.mrb[35].mxu1 }
 0x64a   :  { %v2184_v45 = vpop.permute.xlu1 %2183 }
 0x64b   :  { %v2186_v47 = vunpack.i.h.bf16 %v2184_v45  ;;  %v2185_v48 = vunpack.i.l.bf16 %v2184_v45 }
 0x64d   :  { %v1441_v52 = vsel %vm567_vm1, %v1134_v12, %v2186_v47  ;;  %v1440_v53 = vsel %vm567_vm1, %v1088_v9, %v2185_v48  ;;  %v2231_v12 = vld [vmem:[#allocation16] sm:$0xff]   ;;  %v1865_v47 = vld [vmem:[#allocation14] ss:$0 sm:$0xff] }
 0x64e   :  { %2071 = vmatpush3.bf16.msra.mxu1 %v2231_v12 }
 0x64f   :  { %2072 = vmatprep.subr.bf16.mxu1 %v2609_v0 }
 0x652   :  { %v2189_v46 = vpop.permute.xlu0 %2188  ;;  %2073 = vmatpush3.bf16.msra.mxu1 %v2232_v13 }
 0x653   :  { %v2191_v49 = vunpack.i.h.bf16 %v2189_v46  ;;  %v2190_v50 = vunpack.i.l.bf16 %v2189_v46  ;;  %2074 = vmatprep.subr.bf16.mxu1 %v2609_v0 }
 0x655   :  { %v1444_v56 = vsel %vm1442_vm4, %v1441_v52, %v2191_v49  ;;  %v1443_v57 = vsel %vm1442_vm4, %v1440_v53, %v2190_v50  ;;  %v2245_v52 = vld [vmem:[#allocation19 + $0x30] sm:$0xff]   ;;  %v2246_v53 = vld [vmem:[#allocation19 + $0x38] sm:$0xff]  }
 0x656   :  { %2075 = vmatpush3.bf16.msra.mxu1 %v2233_v14 }
 0x657   :  { %2076 = vmatprep.subr.bf16.mxu1 %v2609_v0 }
 0x65a   :  { %2077 = vmatpush3.bf16.msra.mxu1 %v2234_v15 }
 0x65b   :  { %2078 = vmatprep.subr.bf16.mxu1 %v2609_v0 }
 0x65e   :  { %2079 = vmatpush3.bf16.msra.mxu1 %v2235_v16 }
 0x65f   :  { %2080 = vmatprep.subr.bf16.mxu1 %v2609_v0 }
 0x662   :  { %2081 = vmatpush3.bf16.msra.mxu1 %v2236_v17 }
 0x663   :  { %2082 = vmatprep.subr.bf16.mxu1 %v2609_v0 }
 0x666   :  { %2083 = vmatpush3.bf16.msra.mxu1 %v2237_v18 }
 0x667   :  { %2084 = vmatprep.subr.bf16.mxu1 %v2609_v0 }
 0x66a   :  { %2085 = vmatpush3.bf16.msra.mxu1 %v2238_v19 }
 0x67b   :  { %v2194_v51 = vpop.permute.xlu1 %2193 }
 0x67c   :  { %v2196_v54 = vunpack.i.h.bf16 %v2194_v51  ;;  %v2195_v55 = vunpack.i.l.bf16 %v2194_v51 }
 0x67e   :  { %v1447_v58 = vsel %vm1445_vm5, %v1444_v56, %v2196_v54  ;;  %v1446_v59 = vsel %vm1445_vm5, %v1443_v57, %v2195_v55  ;;  %v1866_v54 = vld [vmem:[#allocation17] ss:$0 sm:$0xff] }
 0x67f   :  { %v1448_v60 = vpack.c.bf16 %v1447_v58, %v1446_v59 }
 0x681   :  { %2067 = vmatmul.mubr.msk.bf16.vlgmr.msra.gmra.mrb[36].mxu0 %vm1472_vm6, %v1448_v60 }
 0x682   :  { %2106 = vmatprep.mubr.msk.bf16.mxu0 %vm2611_vm0, %v2609_v0  ;;  %2091 = vmatpush3.bf16.msra.mxu0 %v2239_v20 }
 0x683   :  { %2092 = vmatprep.subr.bf16.mxu0 %v2609_v0 }
 0x686   :  { %2093 = vmatpush3.bf16.msra.mxu0 %v2240_v21 }
 0x687   :  { %2094 = vmatprep.subr.bf16.mxu0 %v2609_v0 }
 0x68a   :  { %2095 = vmatpush3.bf16.msra.mxu0 %v2241_v22 }
 0x68b   :  { %2096 = vmatprep.subr.bf16.mxu0 %v2609_v0 }
 0x68e   :  { %2097 = vmatpush3.bf16.msra.mxu0 %v2242_v23 }
 0x68f   :  { %2098 = vmatprep.subr.bf16.mxu0 %v2609_v0 }
 0x692   :  { %2099 = vmatpush3.bf16.msra.mxu0 %v2243_v24 }
 0x693   :  { %2100 = vmatprep.subr.bf16.mxu0 %v2609_v0 }
 0x696   :  { %2101 = vmatpush3.bf16.msra.mxu0 %v2244_v25 }
 0x697   :  { %2102 = vmatprep.subr.bf16.mxu0 %v2609_v0 }
 0x69a   :  { %2103 = vmatpush3.bf16.msra.mxu0 %v2245_v52 }
 0x69b   :  { %2104 = vmatprep.subr.bf16.mxu0 %v2609_v0 }
 0x69e   :  { %2105 = vmatpush3.bf16.msra.mxu0 %v2246_v53 }
 0x754   :  { %v1510_v62 = vpop.f32.mrb[36].mxu0 }
 0x755   :  { %v1511_v63 = vadd.f32 %v1860_v61, %v1510_v62  ;;  %v2068_v1 = vpop.f32.mrb[37].mxu0 }
 0x756   :  { %v1513_v2 = vpop.f32.mrb[38].mxu0  ;;  %v1875_v1 = vld [vmem:[#allocation20] ss:$0 sm:$0xff] }
 0x757   :  { %v3062_v4 = vadd.f32 %v2287_v3, %v1511_v63  ;;  %v1514_v5 = vadd.f32 %v1860_v61, %v1513_v2  ;;  %v2069_v6 = vpop.f32.mrb[39].mxu0 }
 0x759   :  { %v3064_v9 = vadd.f32 %v2288_v8, %v1514_v5  ;;  %1521 = vadd.xlane.f32.xlu0 %v3062_v4  ;;  %v1525_v10 = vmul.f32 %v3062_v4, %v3062_v4 }
 0x75b   :  { %1523 = vadd.xlane.f32.xlu1 %v3064_v9  ;;  %v1526_v11 = vmul.f32 %v3064_v9, %v3064_v9 }
 0x75d   :  { %1527 = vadd.xlane.f32.xlu0 %v1525_v10 }
 0x761   :  { %1529 = vadd.xlane.f32.xlu0 %v1526_v11 }
 0x7e6   :  { %v1522_v26 = vpop.xlane.xlu0 %1521 }
 0x7e7   :  { %v1531_v27 = vmul.f32 0.03125, %v1522_v26 }
 0x7e8   :  { %v1524_v28 = vpop.xlane.xlu1 %1523 }
 0x7e9   :  { %v1535_v30 = vmul.f32 %v1531_v27, %v1531_v27  ;;  %v1532_v31 = vmul.f32 0.03125, %v1524_v28  ;;  %v1543_v40 = vsub.f32 %v3062_v4, %v1531_v27 }
 0x7ea   :  { %v1528_v29 = vpop.xlane.xlu0 %1527 }
 0x7eb   :  { %v1533_v32 = vmul.f32 0.03125, %v1528_v29  ;;  %v1536_v35 = vmul.f32 %v1532_v31, %v1532_v31  ;;  %v1544_v43 = vsub.f32 %v3064_v9, %v1532_v31 }
 0x7ed   :  { %v1537_v33 = vsub.f32 %v1533_v32, %v1535_v30 }
 0x7ee   :  { %v1530_v34 = vpop.xlane.xlu0 %1529 }
 0x7ef   :  { %v1539_v36 = vadd.f32 1e-05, %v1537_v33  ;;  %v1534_v37 = vmul.f32 0.03125, %v1530_v34 }
 0x7f1   :  { %2283 = vrsqrt.f32 %v1539_v36  ;;  %v1538_v38 = vsub.f32 %v1534_v37, %v1536_v35 }
 0x7f3   :  { %v1540_v39 = vadd.f32 1e-05, %v1538_v38 }
 0x7f5   :  { %2285 = vrsqrt.f32 %v1540_v39 }
 0x7fb   :  { %v2284_v41 = vpop.eup %2283 }
 0x7fc   :  { %v1545_v7 = vmul.f32 %v2284_v41, %v1543_v40 }
 0x7fe   :  { %v1553_v46 = vmul.f32 %v1864_v42, %v1545_v7 }
 0x7ff   :  { %v2286_v44 = vpop.eup %2285 }
 0x800   :  { %v1546_v45 = vmul.f32 %v2286_v44, %v1544_v43  ;;  %v1561_v49 = vadd.f32 %v1865_v47, %v1553_v46 }
 0x802   :  { %v1554_v48 = vmul.f32 %v1864_v42, %v1546_v45 }
 0x804   :  { %v1562_v50 = vadd.f32 %v1865_v47, %v1554_v48 }
 0x806   :  { %v1563_v51 = vpack.c.bf16 %v1562_v50, %v1561_v49 }
 0x808   :  { %2087 = vmatmul.mubr.bf16.vlgmr.msra.gmra.mrb[36].mxu1 %v1563_v51 }
 0x8db   :  { %v1669_v55 = vpop.f32.mrb[36].mxu1 }
 0x8dc   :  { %v1670_v56 = vadd.f32 %v1866_v54, %v1669_v55  ;;  %v2088_v57 = vpop.f32.mrb[37].mxu1 }
 0x8dd   :  { %v1672_v58 = vpop.f32.mrb[38].mxu1 }
 0x8de   :  { %v1673_v59 = vadd.f32 %v1866_v54, %v1672_v58  ;;  %v2089_v60 = vpop.f32.mrb[39].mxu1  ;;  %v1676_v61 = vmax.f32 %v1670_v56, 0.0 }
 0x8e0   :  { %v1677_v62 = vmax.f32 %v1673_v59, 0.0 }
 0x8e2   :  { %v1678_v63 = vpack.c.bf16 %v1677_v62, %v1676_v61 }
 0x8e4   :  { %2107 = vmatmul.mubr.bf16.vlgmr.msra.gmra.mrb[40].mxu0 %v1678_v63 }
 0x9b7   :  { %v1784_v2 = vpop.f32.mrb[40].mxu0 }
 0x9b8   :  { %v1785_v3 = vadd.f32 %v1875_v1, %v1784_v2  ;;  %v2108_v5 = vpop.f32.mrb[41].mxu0 }
 0x9b9   :  { %v1787_v6 = vpop.f32.mrb[42].mxu0 }
 0x9ba   :  { %v1791_v0 = vadd.f32 %v1785_v3, %v3062_v4  ;;  %v1788_v8 = vadd.f32 %v1875_v1, %v1787_v6  ;;  %v2109_v10 = vpop.f32.mrb[43].mxu0 }
 0x9bc   :  { %1793 = vst [vmem:[#allocation22] sm:$0xff] %v1791_v0  ;;  %v1792_v11 = vadd.f32 %v1788_v8, %v3064_v9 }
 0x9be   :  { %1794 = vst [vmem:[#allocation22 + $0x8] sm:$0xff] %v1792_v11 }
 0x9bf   :  { %2564 = shalt.err (!%p2561_p2)
}
 0x9c0   :  { %s2565_s16 = scalar_lea.hbm %s3117_s12, 256 }
 0x9c1   :  { %p2566_p3 = scmp.ne.s32.totalorder %s3117_s12, %s2565_s16  ;;  %p2569_p4 = scmp.lt.u32.totalorder %s2565_s16, %s3117_s12 }
 0x9c3   :  { %p2571_p5 = pnand %p2569_p4, %p2566_p3 }
 0x9c5   :  { %2574 = shalt.err (!%p2571_p5)
}
 0x9c6   :  { %1806 = dma.vmem_to_hbm [thread:$0]  %s1801_s0, 256, %s3117_s12, [#allocation4], %s2599_s9, %s2599_s9, %s2600_s19  }
 0x9c7   :  { %2589 = dma.done.wait [#allocation4], 256  }
 0x9c8   :  { %2590 = vsyncadd [#allocation4], 4294967040 }
 0x9c9   :  { %1810 = vsyncpa [#allocation3], 1 }
 0x9ca   :  { %1811 = vsyncpa [#allocation6], 1 }
 0x9cb   :  { %1812 = vsyncpa [#allocation9], 1 }
 0x9cc   :  { %1813 = vsyncpa [#allocation12], 1 }
 0x9cd   :  { %1814 = vsyncpa [#allocation15], 1 }
 0x9ce   :  { %1815 = vsyncpa [#allocation18], 1 }
 0x9cf   :  { %1816 = vsyncpa [#allocation21], 1 }
 0x9d0   :  { %1817 = vsyncpa [#allocation4], 1 }

</bundles_post_ra>
